<compile_context>
chip_gen: v5e
topology: v5e:2x2
jax: 0.10.0
libtpu: 0.0.40
codegen_flags: <defaults>
</compile_context>

<pallas_src>
import jax
import jax.numpy as jnp
from jax.experimental import pallas as pl
from jax.experimental.pallas import tpu as pltpu

# ---- module-consistent hyper-parameters ----
IN_DIM = 2       # input feature dim C
OUT_DIM = 1      # output dim
OUT_LEN = 4      # output sequence length Q
N_LAYERS = 2     # number of AGCGRU layers (kernel is specialised to 2)
H_DIM = 32       # hidden dim
CHEB_K = 2       # chebyshev order
N_SERIES = 16    # number of nodes N
EMB_DIM = 4      # node embedding dim
BATCH = 2        # B
SEQ_LEN = 8      # P

HIGHEST = jax.lax.Precision.HIGHEST


# ----------------------------------------------------------------------------
# Fused Pallas kernel: time loop + 2 AGCGRU layers + output projection.
# ----------------------------------------------------------------------------
def agcrn_fused_kernel(x_ref, ak_ref, eb_ref,
                       px0_ref, pgh0_ref, pch0_ref, bg0_ref, bc0_ref,
                       px1_ref, pgh1_ref, pch1_ref, bg1_ref, bc1_ref,
                       wout_ref, bout_ref,
                       out_ref):
    p = x_ref.shape[0]
    m, h_dim = bc0_ref.shape            # (M, H)
    n_sup = ak_ref.shape[0]             # CHEB_K - 1 supports (k = 0 identity skipped)
    d_emb = eb_ref.shape[0]             # node-embedding dim D
    g_cols = d_emb * 2 * h_dim          # 256: gate half of the fused x-projection

    def graph_stack(v):
        # [v, A_1 v, ...] stacked along features (k-major); k = 0 == identity.
        mixes = [v] + [jnp.dot(ak_ref[k], v, preferred_element_type=jnp.float32)
                       for k in range(n_sup)]
        return jnp.concatenate(mixes, axis=1)

    def ereduce(tmat, width):
        # out[m, o] = sum_d E[n(m), d] * tmat[m, d*width + o]   (unrolled, D=4)
        acc = eb_ref[0][:, :width] * tmat[:, :width]
        for d in range(1, d_emb):
            acc = acc + eb_ref[d][:, :width] * tmat[:, d * width:(d + 1) * width]
        return acc

    def gru_cell(xk, h, px_ref, pgh_ref, pch_ref, bg_ref, bc_ref):
        # xk: graph-stacked input features (M, K*Cx); h: (M, H)
        hk = graph_stack(h)                                        # (M, K*H)
        # One fused x-side matmul feeding BOTH gate and candidate paths.
        tx = jnp.dot(xk, px_ref[...], preferred_element_type=jnp.float32)
        tg = tx[:, :g_cols] + jnp.dot(hk, pgh_ref[...],
                                      preferred_element_type=jnp.float32)
        zr = jax.nn.sigmoid(ereduce(tg, 2 * h_dim) + bg_ref[...])  # (M, 2H)
        z = zr[:, :h_dim]
        r = zr[:, h_dim:]
        zhk = graph_stack(z * h)                                   # (M, K*H)
        tc = tx[:, g_cols:] + jnp.dot(zhk, pch_ref[...],
                                      preferred_element_type=jnp.float32)
        hc = jnp.tanh(ereduce(tc, h_dim) + bc_ref[...])            # (M, H)
        return r * h + (1.0 - r) * hc

    def step(t, carry):
        h1, h2 = carry
        x_t = x_ref[t]                                             # (M, C_in)
        h1 = gru_cell(graph_stack(x_t), h1,
                      px0_ref, pgh0_ref, pch0_ref, bg0_ref, bc0_ref)
        h2 = gru_cell(graph_stack(h1), h2,
                      px1_ref, pgh1_ref, pch1_ref, bg1_ref, bc1_ref)
        return (h1, h2)

    h0 = jnp.zeros((m, h_dim), jnp.float32)
    _, h2 = jax.lax.fori_loop(0, p, step, (h0, h0))

    # Conv2d(1, Q, kernel=(1, H)) == matmul over H on the final hidden state.
    out_ref[...] = (jnp.dot(h2, wout_ref[...], preferred_element_type=jnp.float32)
                    + bout_ref[...]).astype(out_ref.dtype)


def run_fused(x_tm, a_kron, e_b, l0, l1, w_out, b_out):
    m = x_tm.shape[1]
    q = w_out.shape[1]
    operands = (x_tm, a_kron, e_b, *l0, *l1, w_out, b_out)
    vmem = pl.BlockSpec(memory_space=pltpu.MemorySpace.VMEM)
    return pl.pallas_call(
        agcrn_fused_kernel,
        out_shape=jax.ShapeDtypeStruct((m, q), jnp.float32),
        in_specs=[vmem] * len(operands),
        out_specs=pl.BlockSpec(memory_space=pltpu.MemorySpace.VMEM),
    )(*operands)


# ----------------------------------------------------------------------------
# Parameter-only glue (graph structure learner + pool re-layout)
# ----------------------------------------------------------------------------
def gs_learner(node_embs, n, cheb_k):
    sim = node_embs @ node_embs.T
    supports = jax.nn.softmax(jax.nn.relu(sim), axis=1)
    sset = [jnp.eye(n, dtype=supports.dtype), supports]
    for _ in range(2, cheb_k):
        sset.append(2.0 * supports @ sset[-1] - sset[-2])
    return jnp.stack(sset, axis=0)          # (cheb_k, N, N)


def agcrn_forward_pallas(x, params):
    assert N_LAYERS == 2, "fused kernel is specialised to 2 AGCGRU layers"
    bsz, p, n, c_in = x.shape
    e = params['node_embs']                                   # (N, D)
    d_emb = e.shape[1]
    m = n * bsz

    supports = gs_learner(e, n, CHEB_K)                       # (K, N, N)
    eye_b = jnp.eye(bsz, dtype=jnp.float32)
    # kron(A_k, I_B) for k >= 1; k = 0 (identity) is handled implicitly in-kernel.
    a_kron = jnp.stack([jnp.kron(supports[k], eye_b)
                        for k in range(1, CHEB_K)], axis=0)   # (K-1, M, M)

    # Single input transpose to time-major / node-major lane-dense layout.
    x_tm = jnp.transpose(x.astype(jnp.float32), (1, 2, 0, 3)).reshape(p, m, c_in)

    # Broadcast node embeddings for the in-kernel D-reduction: (D, M, 2H).
    e_nb = jnp.repeat(e, bsz, axis=0)                         # (M, D), n-major
    e_b = jnp.broadcast_to(jnp.transpose(e_nb)[:, :, None],
                           (d_emb, m, 2 * H_DIM)).astype(jnp.float32)

    def layer_pools(layer, c_x):
        def split(pool):
            # pool: (D, K, c_x + H, O)  ->  x-part (K*c_x, D*O), h-part (K*H, D*O)
            o = pool.shape[-1]
            px = jnp.transpose(pool[:, :, :c_x, :], (1, 2, 0, 3)).reshape(
                CHEB_K * c_x, d_emb * o)
            ph = jnp.transpose(pool[:, :, c_x:, :], (1, 2, 0, 3)).reshape(
                CHEB_K * H_DIM, d_emb * o)
            return px, ph
        pgx, pgh = split(layer['Wg_pool'])
        pcx, pch = split(layer['Wc_pool'])
        # Fuse gate + candidate x-side pools -> one in-kernel x matmul;
        # the in-kernel split column (D*2H = 256) is 128-aligned.
        px_all = jnp.concatenate([pgx, pcx], axis=1)          # (K*c_x, D*3H)
        bg = jnp.repeat(e @ layer['bg_pool'], bsz, axis=0)    # (M, 2H)
        bc = jnp.repeat(e @ layer['bc_pool'], bsz, axis=0)    # (M, H)
        return px_all, pgh, pch, bg, bc

    l0 = layer_pools(params['layers'][0], c_in)
    l1 = layer_pools(params['layers'][1], H_DIM)

    q = OUT_LEN * OUT_DIM
    w_out = params['conv_w'].reshape(q, H_DIM).T              # (H, Q)
    b_out = params['conv_b'].reshape(1, q)

    o2 = run_fused(x_tm, a_kron, e_b, l0, l1, w_out, b_out)   # (M, Q)
    out = jnp.transpose(o2.reshape(n, bsz, q), (1, 2, 0))     # (B, Q, N)
    out = out.reshape(bsz, OUT_LEN, OUT_DIM, n)
    if OUT_DIM == 1:
        out = out[:, :, 0, :]                                 # torch squeeze(dim=2)
    return out


# ----------------------------------------------------------------------------
# Pure-JAX reference (mirrors the PyTorch semantics) for verification
# ----------------------------------------------------------------------------
def agcrn_forward_reference(x, params):
    bsz, p, n, _ = x.shape
    e = params['node_embs']
    a_sup = gs_learner(e, n, CHEB_K)

    def avwgcn(xin, wpool, bpool):
        w = jnp.einsum('nd,dkio->nkio', e, wpool, precision=HIGHEST)
        b = e @ bpool
        x_g = jnp.einsum('knm,bmc->bknc', a_sup, xin, precision=HIGHEST)
        x_g = jnp.transpose(x_g, (0, 2, 1, 3))
        return jnp.einsum('bnki,nkio->bno', x_g, w, precision=HIGHEST) + b

    hs = x.astype(jnp.float32)
    for layer in params['layers']:
        h = jnp.zeros((bsz, n, H_DIM), jnp.float32)
        outs = []
        for t in range(p):
            xt = hs[:, t]
            cat = jnp.concatenate([xt, h], -1)
            zr = jax.nn.sigmoid(avwgcn(cat, layer['Wg_pool'], layer['bg_pool']))
            z, r = zr[..., :H_DIM], zr[..., H_DIM:]
            cand = jnp.concatenate([xt, z * h], -1)
            hc = jnp.tanh(avwgcn(cand, layer['Wc_pool'], layer['bc_pool']))
            h = r * h + (1.0 - r) * hc
            outs.append(h)
        hs = jnp.stack(outs, axis=1)
    h_last = hs[:, -1]
    q = OUT_LEN * OUT_DIM
    w2d = params['conv_w'].reshape(q, H_DIM)
    out = jnp.einsum('bnh,qh->bqn', h_last, w2d,
                     precision=HIGHEST) + params['conv_b'][None, :, None]
    out = out.reshape(bsz, OUT_LEN, OUT_DIM, n)
    if OUT_DIM == 1:
        out = out[:, :, 0, :]
    return out


# ----------------------------------------------------------------------------
# Deterministic parameter init (shapes from the module __init__)
# ----------------------------------------------------------------------------
def _xavier(key, shape):
    fan_in, fan_out = shape[-2], shape[-1]
    lim = (6.0 / (fan_in + fan_out)) ** 0.5
    return jax.random.uniform(key, shape, jnp.float32, -lim, lim)


def init_params(key):
    keys = jax.random.split(key, 3 + 4 * N_LAYERS)
    params = {'node_embs': jax.random.normal(keys[0], (N_SERIES, EMB_DIM),
                                             jnp.float32)}
    layers = []
    ki = 1
    for layer in range(N_LAYERS):
        c_in = IN_DIM if layer == 0 else H_DIM
        cf = c_in + H_DIM
        layers.append({
            'Wg_pool': _xavier(keys[ki + 0], (EMB_DIM, CHEB_K, cf, 2 * H_DIM)),
            'bg_pool': jax.random.uniform(keys[ki + 1], (EMB_DIM, 2 * H_DIM),
                                          jnp.float32, -0.1, 0.1),
            'Wc_pool': _xavier(keys[ki + 2], (EMB_DIM, CHEB_K, cf, H_DIM)),
            'bc_pool': jax.random.uniform(keys[ki + 3], (EMB_DIM, H_DIM),
                                          jnp.float32, -0.1, 0.1),
        })
        ki += 4
    params['layers'] = layers
    q = OUT_LEN * OUT_DIM
    params['conv_w'] = _xavier(keys[ki], (q, 1, 1, H_DIM))     # Conv2d weight
    params['conv_b'] = jax.random.uniform(keys[ki + 1], (q,), jnp.float32,
                                          -0.1, 0.1)           # Conv2d bias
    return params


if __name__ == "__main__":
    key = jax.random.PRNGKey(0)
    pkey, xkey = jax.random.split(key)
    params = init_params(pkey)
    x = jax.random.normal(xkey, (BATCH, SEQ_LEN, N_SERIES, IN_DIM), jnp.float32)

    fwd = jax.jit(agcrn_forward_pallas)
    out = jax.block_until_ready(fwd(x, params))
    assert out.shape == (BATCH, OUT_LEN, N_SERIES), out.shape

    ref = agcrn_forward_reference(x, params)
    # Kernel matmuls run at default (bf16-pass) MXU precision with f32 accum;
    # reference uses HIGHEST, so allow a small bf16-level tolerance.
    err = float(jnp.max(jnp.abs(out - ref)))
    assert err < 5e-2, f"mismatch vs reference: {err}"
    print("KERNEL_OK")
</pallas_src>

<mosaic_0001>
module attributes {stable_mosaic.version = 11 : i64} {
  func.func @agcrn_fused_kernel(%arg0: memref<8x32x2xf32, #tpu.memory_space<vmem>>, %arg1: memref<1x32x32xf32, #tpu.memory_space<vmem>>, %arg2: memref<4x32x64xf32, #tpu.memory_space<vmem>>, %arg3: memref<4x384xf32, #tpu.memory_space<vmem>>, %arg4: memref<64x256xf32, #tpu.memory_space<vmem>>, %arg5: memref<64x128xf32, #tpu.memory_space<vmem>>, %arg6: memref<32x64xf32, #tpu.memory_space<vmem>>, %arg7: memref<32x32xf32, #tpu.memory_space<vmem>>, %arg8: memref<64x384xf32, #tpu.memory_space<vmem>>, %arg9: memref<64x256xf32, #tpu.memory_space<vmem>>, %arg10: memref<64x128xf32, #tpu.memory_space<vmem>>, %arg11: memref<32x64xf32, #tpu.memory_space<vmem>>, %arg12: memref<32x32xf32, #tpu.memory_space<vmem>>, %arg13: memref<32x4xf32, #tpu.memory_space<vmem>>, %arg14: memref<1x4xf32, #tpu.memory_space<vmem>>, %arg15: memref<32x4xf32, #tpu.memory_space<vmem>>) attributes {dimension_semantics = [], scalar_prefetch = 0 : i64, scratch_operands = 0 : i64, tpu.core_type = #tpu.core_type<tc>} {
    %cst = arith.constant 0.000000e+00 : f32
    %0 = vector.broadcast %cst : f32 to vector<32x32xf32>
    %c0_i32 = arith.constant 0 : i32
    %c8_i32 = arith.constant 8 : i32
    %1 = arith.addi %c0_i32, %c8_i32 : i32
    %c1_i32 = arith.constant 1 : i32
    %2:2 = scf.for %arg16 = %c0_i32 to %1 step %c1_i32 iter_args(%arg17 = %0, %arg18 = %0) -> (vector<32x32xf32>, vector<32x32xf32>)  : i32 {
      %9 = arith.index_cast %arg16 : i32 to index
      %c0_7 = arith.constant 0 : index
      %c0_8 = arith.constant 0 : index
      %10 = vector.load %arg0[%9, %c0_7, %c0_8] : memref<8x32x2xf32, #tpu.memory_space<vmem>>, vector<1x32x2xf32>
      %11 = vector.shape_cast %10 : vector<1x32x2xf32> to vector<32x2xf32>
      %c0_9 = arith.constant 0 : index
      %c0_10 = arith.constant 0 : index
      %c0_11 = arith.constant 0 : index
      %12 = vector.load %arg1[%c0_9, %c0_10, %c0_11] : memref<1x32x32xf32, #tpu.memory_space<vmem>>, vector<1x32x32xf32>
      %13 = vector.shape_cast %12 : vector<1x32x32xf32> to vector<32x32xf32>
      %cst_12 = arith.constant dense<0.000000e+00> : vector<32x2xf32>
      %14 = tpu.matmul %13, %11, %cst_12 {dimension_numbers = #tpu.dot_dimension_numbers<[1], [0], [0], [1], [0, 0, 1, 1], [], []>} : vector<32x32xf32>, vector<32x2xf32>, vector<32x2xf32> -> vector<32x2xf32>
      %15 = tpu.concatenate %11, %14 in 1 : vector<32x2xf32>, vector<32x2xf32> -> vector<32x4xf32>
      %c0_13 = arith.constant 0 : index
      %c0_14 = arith.constant 0 : index
      %c0_15 = arith.constant 0 : index
      %16 = vector.load %arg1[%c0_13, %c0_14, %c0_15] : memref<1x32x32xf32, #tpu.memory_space<vmem>>, vector<1x32x32xf32>
      %17 = vector.shape_cast %16 : vector<1x32x32xf32> to vector<32x32xf32>
      %cst_16 = arith.constant dense<0.000000e+00> : vector<32x32xf32>
      %18 = tpu.matmul %17, %arg17, %cst_16 {dimension_numbers = #tpu.dot_dimension_numbers<[1], [0], [0], [1], [0, 0, 1, 1], [], []>} : vector<32x32xf32>, vector<32x32xf32>, vector<32x32xf32> -> vector<32x32xf32>
      %19 = tpu.concatenate %arg17, %18 in 1 : vector<32x32xf32>, vector<32x32xf32> -> vector<32x64xf32>
      %c0_17 = arith.constant 0 : index
      %c0_18 = arith.constant 0 : index
      %20 = vector.load %arg3[%c0_17, %c0_18] : memref<4x384xf32, #tpu.memory_space<vmem>>, vector<4x384xf32>
      %cst_19 = arith.constant dense<0.000000e+00> : vector<32x384xf32>
      %21 = tpu.matmul %15, %20, %cst_19 {dimension_numbers = #tpu.dot_dimension_numbers<[1], [0], [0], [1], [0, 0, 1, 1], [], []>} : vector<32x4xf32>, vector<4x384xf32>, vector<32x384xf32> -> vector<32x384xf32>
      %22 = vector.extract_strided_slice %21 {offsets = [0, 0], sizes = [32, 256], strides = [1, 1]} : vector<32x384xf32> to vector<32x256xf32>
      %c0_20 = arith.constant 0 : index
      %c0_21 = arith.constant 0 : index
      %23 = vector.load %arg4[%c0_20, %c0_21] : memref<64x256xf32, #tpu.memory_space<vmem>>, vector<64x256xf32>
      %cst_22 = arith.constant dense<0.000000e+00> : vector<32x256xf32>
      %24 = tpu.matmul %19, %23, %cst_22 {dimension_numbers = #tpu.dot_dimension_numbers<[1], [0], [0], [1], [0, 0, 1, 1], [], []>} : vector<32x64xf32>, vector<64x256xf32>, vector<32x256xf32> -> vector<32x256xf32>
      %25 = arith.addf %22, %24 : vector<32x256xf32>
      %c0_23 = arith.constant 0 : index
      %c0_24 = arith.constant 0 : index
      %c0_25 = arith.constant 0 : index
      %26 = vector.load %arg2[%c0_23, %c0_24, %c0_25] : memref<4x32x64xf32, #tpu.memory_space<vmem>>, vector<1x32x64xf32>
      %27 = vector.shape_cast %26 : vector<1x32x64xf32> to vector<32x64xf32>
      %28 = vector.extract_strided_slice %25 {offsets = [0, 0], sizes = [32, 64], strides = [1, 1]} : vector<32x256xf32> to vector<32x64xf32>
      %29 = arith.mulf %27, %28 : vector<32x64xf32>
      %c1 = arith.constant 1 : index
      %c0_26 = arith.constant 0 : index
      %c0_27 = arith.constant 0 : index
      %30 = vector.load %arg2[%c1, %c0_26, %c0_27] : memref<4x32x64xf32, #tpu.memory_space<vmem>>, vector<1x32x64xf32>
      %31 = vector.shape_cast %30 : vector<1x32x64xf32> to vector<32x64xf32>
      %32 = vector.extract_strided_slice %25 {offsets = [0, 64], sizes = [32, 64], strides = [1, 1]} : vector<32x256xf32> to vector<32x64xf32>
      %33 = arith.mulf %31, %32 : vector<32x64xf32>
      %34 = arith.addf %29, %33 : vector<32x64xf32>
      %c2 = arith.constant 2 : index
      %c0_28 = arith.constant 0 : index
      %c0_29 = arith.constant 0 : index
      %35 = vector.load %arg2[%c2, %c0_28, %c0_29] : memref<4x32x64xf32, #tpu.memory_space<vmem>>, vector<1x32x64xf32>
      %36 = vector.shape_cast %35 : vector<1x32x64xf32> to vector<32x64xf32>
      %37 = vector.extract_strided_slice %25 {offsets = [0, 128], sizes = [32, 64], strides = [1, 1]} : vector<32x256xf32> to vector<32x64xf32>
      %38 = arith.mulf %36, %37 : vector<32x64xf32>
      %39 = arith.addf %34, %38 : vector<32x64xf32>
      %c3 = arith.constant 3 : index
      %c0_30 = arith.constant 0 : index
      %c0_31 = arith.constant 0 : index
      %40 = vector.load %arg2[%c3, %c0_30, %c0_31] : memref<4x32x64xf32, #tpu.memory_space<vmem>>, vector<1x32x64xf32>
      %41 = vector.shape_cast %40 : vector<1x32x64xf32> to vector<32x64xf32>
      %42 = vector.extract_strided_slice %25 {offsets = [0, 192], sizes = [32, 64], strides = [1, 1]} : vector<32x256xf32> to vector<32x64xf32>
      %43 = arith.mulf %41, %42 : vector<32x64xf32>
      %44 = arith.addf %39, %43 : vector<32x64xf32>
      %c0_32 = arith.constant 0 : index
      %c0_33 = arith.constant 0 : index
      %45 = vector.load %arg6[%c0_32, %c0_33] : memref<32x64xf32, #tpu.memory_space<vmem>>, vector<32x64xf32>
      %46 = arith.addf %44, %45 : vector<32x64xf32>
      %47 = arith.negf %46 : vector<32x64xf32>
      %48 = math.exp %47 : vector<32x64xf32>
      %cst_34 = arith.constant 1.000000e+00 : f32
      %49 = vector.broadcast %cst_34 : f32 to vector<32x64xf32>
      %50 = arith.addf %49, %48 : vector<32x64xf32>
      %51 = arith.divf %49, %50 : vector<32x64xf32>
      %52 = vector.extract_strided_slice %51 {offsets = [0, 0], sizes = [32, 32], strides = [1, 1]} : vector<32x64xf32> to vector<32x32xf32>
      %53 = vector.extract_strided_slice %51 {offsets = [0, 32], sizes = [32, 32], strides = [1, 1]} : vector<32x64xf32> to vector<32x32xf32>
      %54 = arith.mulf %52, %arg17 : vector<32x32xf32>
      %c0_35 = arith.constant 0 : index
      %c0_36 = arith.constant 0 : index
      %c0_37 = arith.constant 0 : index
      %55 = vector.load %arg1[%c0_35, %c0_36, %c0_37] : memref<1x32x32xf32, #tpu.memory_space<vmem>>, vector<1x32x32xf32>
      %56 = vector.shape_cast %55 : vector<1x32x32xf32> to vector<32x32xf32>
      %cst_38 = arith.constant dense<0.000000e+00> : vector<32x32xf32>
      %57 = tpu.matmul %56, %54, %cst_38 {dimension_numbers = #tpu.dot_dimension_numbers<[1], [0], [0], [1], [0, 0, 1, 1], [], []>} : vector<32x32xf32>, vector<32x32xf32>, vector<32x32xf32> -> vector<32x32xf32>
      %58 = tpu.concatenate %54, %57 in 1 : vector<32x32xf32>, vector<32x32xf32> -> vector<32x64xf32>
      %59 = vector.extract_strided_slice %21 {offsets = [0, 256], sizes = [32, 128], strides = [1, 1]} : vector<32x384xf32> to vector<32x128xf32>
      %c0_39 = arith.constant 0 : index
      %c0_40 = arith.constant 0 : index
      %60 = vector.load %arg5[%c0_39, %c0_40] : memref<64x128xf32, #tpu.memory_space<vmem>>, vector<64x128xf32>
      %cst_41 = arith.constant dense<0.000000e+00> : vector<32x128xf32>
      %61 = tpu.matmul %58, %60, %cst_41 {dimension_numbers = #tpu.dot_dimension_numbers<[1], [0], [0], [1], [0, 0, 1, 1], [], []>} : vector<32x64xf32>, vector<64x128xf32>, vector<32x128xf32> -> vector<32x128xf32>
      %62 = arith.addf %59, %61 : vector<32x128xf32>
      %c0_42 = arith.constant 0 : index
      %c0_43 = arith.constant 0 : index
      %c0_44 = arith.constant 0 : index
      %63 = vector.load %arg2[%c0_42, %c0_43, %c0_44] : memref<4x32x64xf32, #tpu.memory_space<vmem>>, vector<1x32x64xf32>
      %64 = vector.shape_cast %63 : vector<1x32x64xf32> to vector<32x64xf32>
      %65 = vector.extract_strided_slice %64 {offsets = [0, 0], sizes = [32, 32], strides = [1, 1]} : vector<32x64xf32> to vector<32x32xf32>
      %66 = vector.extract_strided_slice %62 {offsets = [0, 0], sizes = [32, 32], strides = [1, 1]} : vector<32x128xf32> to vector<32x32xf32>
      %67 = arith.mulf %65, %66 : vector<32x32xf32>
      %c1_45 = arith.constant 1 : index
      %c0_46 = arith.constant 0 : index
      %c0_47 = arith.constant 0 : index
      %68 = vector.load %arg2[%c1_45, %c0_46, %c0_47] : memref<4x32x64xf32, #tpu.memory_space<vmem>>, vector<1x32x64xf32>
      %69 = vector.shape_cast %68 : vector<1x32x64xf32> to vector<32x64xf32>
      %70 = vector.extract_strided_slice %69 {offsets = [0, 0], sizes = [32, 32], strides = [1, 1]} : vector<32x64xf32> to vector<32x32xf32>
      %71 = vector.extract_strided_slice %62 {offsets = [0, 32], sizes = [32, 32], strides = [1, 1]} : vector<32x128xf32> to vector<32x32xf32>
      %72 = arith.mulf %70, %71 : vector<32x32xf32>
      %73 = arith.addf %67, %72 : vector<32x32xf32>
      %c2_48 = arith.constant 2 : index
      %c0_49 = arith.constant 0 : index
      %c0_50 = arith.constant 0 : index
      %74 = vector.load %arg2[%c2_48, %c0_49, %c0_50] : memref<4x32x64xf32, #tpu.memory_space<vmem>>, vector<1x32x64xf32>
      %75 = vector.shape_cast %74 : vector<1x32x64xf32> to vector<32x64xf32>
      %76 = vector.extract_strided_slice %75 {offsets = [0, 0], sizes = [32, 32], strides = [1, 1]} : vector<32x64xf32> to vector<32x32xf32>
      %77 = vector.extract_strided_slice %62 {offsets = [0, 64], sizes = [32, 32], strides = [1, 1]} : vector<32x128xf32> to vector<32x32xf32>
      %78 = arith.mulf %76, %77 : vector<32x32xf32>
      %79 = arith.addf %73, %78 : vector<32x32xf32>
      %c3_51 = arith.constant 3 : index
      %c0_52 = arith.constant 0 : index
      %c0_53 = arith.constant 0 : index
      %80 = vector.load %arg2[%c3_51, %c0_52, %c0_53] : memref<4x32x64xf32, #tpu.memory_space<vmem>>, vector<1x32x64xf32>
      %81 = vector.shape_cast %80 : vector<1x32x64xf32> to vector<32x64xf32>
      %82 = vector.extract_strided_slice %81 {offsets = [0, 0], sizes = [32, 32], strides = [1, 1]} : vector<32x64xf32> to vector<32x32xf32>
      %83 = vector.extract_strided_slice %62 {offsets = [0, 96], sizes = [32, 32], strides = [1, 1]} : vector<32x128xf32> to vector<32x32xf32>
      %84 = arith.mulf %82, %83 : vector<32x32xf32>
      %85 = arith.addf %79, %84 : vector<32x32xf32>
      %c0_54 = arith.constant 0 : index
      %c0_55 = arith.constant 0 : index
      %86 = vector.load %arg7[%c0_54, %c0_55] : memref<32x32xf32, #tpu.memory_space<vmem>>, vector<32x32xf32>
      %87 = arith.addf %85, %86 : vector<32x32xf32>
      %88 = math.tanh %87 : vector<32x32xf32>
      %89 = arith.mulf %53, %arg17 : vector<32x32xf32>
      %cst_56 = arith.constant 1.000000e+00 : f32
      %90 = vector.broadcast %cst_56 : f32 to vector<32x32xf32>
      %91 = arith.subf %90, %53 : vector<32x32xf32>
      %92 = arith.mulf %91, %88 : vector<32x32xf32>
      %93 = arith.addf %89, %92 : vector<32x32xf32>
      %c0_57 = arith.constant 0 : index
      %c0_58 = arith.constant 0 : index
      %c0_59 = arith.constant 0 : index
      %94 = vector.load %arg1[%c0_57, %c0_58, %c0_59] : memref<1x32x32xf32, #tpu.memory_space<vmem>>, vector<1x32x32xf32>
      %95 = vector.shape_cast %94 : vector<1x32x32xf32> to vector<32x32xf32>
      %cst_60 = arith.constant dense<0.000000e+00> : vector<32x32xf32>
      %96 = tpu.matmul %95, %93, %cst_60 {dimension_numbers = #tpu.dot_dimension_numbers<[1], [0], [0], [1], [0, 0, 1, 1], [], []>} : vector<32x32xf32>, vector<32x32xf32>, vector<32x32xf32> -> vector<32x32xf32>
      %97 = tpu.concatenate %93, %96 in 1 : vector<32x32xf32>, vector<32x32xf32> -> vector<32x64xf32>
      %c0_61 = arith.constant 0 : index
      %c0_62 = arith.constant 0 : index
      %c0_63 = arith.constant 0 : index
      %98 = vector.load %arg1[%c0_61, %c0_62, %c0_63] : memref<1x32x32xf32, #tpu.memory_space<vmem>>, vector<1x32x32xf32>
      %99 = vector.shape_cast %98 : vector<1x32x32xf32> to vector<32x32xf32>
      %cst_64 = arith.constant dense<0.000000e+00> : vector<32x32xf32>
      %100 = tpu.matmul %99, %arg18, %cst_64 {dimension_numbers = #tpu.dot_dimension_numbers<[1], [0], [0], [1], [0, 0, 1, 1], [], []>} : vector<32x32xf32>, vector<32x32xf32>, vector<32x32xf32> -> vector<32x32xf32>
      %101 = tpu.concatenate %arg18, %100 in 1 : vector<32x32xf32>, vector<32x32xf32> -> vector<32x64xf32>
      %c0_65 = arith.constant 0 : index
      %c0_66 = arith.constant 0 : index
      %102 = vector.load %arg8[%c0_65, %c0_66] : memref<64x384xf32, #tpu.memory_space<vmem>>, vector<64x384xf32>
      %cst_67 = arith.constant dense<0.000000e+00> : vector<32x384xf32>
      %103 = tpu.matmul %97, %102, %cst_67 {dimension_numbers = #tpu.dot_dimension_numbers<[1], [0], [0], [1], [0, 0, 1, 1], [], []>} : vector<32x64xf32>, vector<64x384xf32>, vector<32x384xf32> -> vector<32x384xf32>
      %104 = vector.extract_strided_slice %103 {offsets = [0, 0], sizes = [32, 256], strides = [1, 1]} : vector<32x384xf32> to vector<32x256xf32>
      %c0_68 = arith.constant 0 : index
      %c0_69 = arith.constant 0 : index
      %105 = vector.load %arg9[%c0_68, %c0_69] : memref<64x256xf32, #tpu.memory_space<vmem>>, vector<64x256xf32>
      %cst_70 = arith.constant dense<0.000000e+00> : vector<32x256xf32>
      %106 = tpu.matmul %101, %105, %cst_70 {dimension_numbers = #tpu.dot_dimension_numbers<[1], [0], [0], [1], [0, 0, 1, 1], [], []>} : vector<32x64xf32>, vector<64x256xf32>, vector<32x256xf32> -> vector<32x256xf32>
      %107 = arith.addf %104, %106 : vector<32x256xf32>
      %c0_71 = arith.constant 0 : index
      %c0_72 = arith.constant 0 : index
      %c0_73 = arith.constant 0 : index
      %108 = vector.load %arg2[%c0_71, %c0_72, %c0_73] : memref<4x32x64xf32, #tpu.memory_space<vmem>>, vector<1x32x64xf32>
      %109 = vector.shape_cast %108 : vector<1x32x64xf32> to vector<32x64xf32>
      %110 = vector.extract_strided_slice %107 {offsets = [0, 0], sizes = [32, 64], strides = [1, 1]} : vector<32x256xf32> to vector<32x64xf32>
      %111 = arith.mulf %109, %110 : vector<32x64xf32>
      %c1_74 = arith.constant 1 : index
      %c0_75 = arith.constant 0 : index
      %c0_76 = arith.constant 0 : index
      %112 = vector.load %arg2[%c1_74, %c0_75, %c0_76] : memref<4x32x64xf32, #tpu.memory_space<vmem>>, vector<1x32x64xf32>
      %113 = vector.shape_cast %112 : vector<1x32x64xf32> to vector<32x64xf32>
      %114 = vector.extract_strided_slice %107 {offsets = [0, 64], sizes = [32, 64], strides = [1, 1]} : vector<32x256xf32> to vector<32x64xf32>
      %115 = arith.mulf %113, %114 : vector<32x64xf32>
      %116 = arith.addf %111, %115 : vector<32x64xf32>
      %c2_77 = arith.constant 2 : index
      %c0_78 = arith.constant 0 : index
      %c0_79 = arith.constant 0 : index
      %117 = vector.load %arg2[%c2_77, %c0_78, %c0_79] : memref<4x32x64xf32, #tpu.memory_space<vmem>>, vector<1x32x64xf32>
      %118 = vector.shape_cast %117 : vector<1x32x64xf32> to vector<32x64xf32>
      %119 = vector.extract_strided_slice %107 {offsets = [0, 128], sizes = [32, 64], strides = [1, 1]} : vector<32x256xf32> to vector<32x64xf32>
      %120 = arith.mulf %118, %119 : vector<32x64xf32>
      %121 = arith.addf %116, %120 : vector<32x64xf32>
      %c3_80 = arith.constant 3 : index
      %c0_81 = arith.constant 0 : index
      %c0_82 = arith.constant 0 : index
      %122 = vector.load %arg2[%c3_80, %c0_81, %c0_82] : memref<4x32x64xf32, #tpu.memory_space<vmem>>, vector<1x32x64xf32>
      %123 = vector.shape_cast %122 : vector<1x32x64xf32> to vector<32x64xf32>
      %124 = vector.extract_strided_slice %107 {offsets = [0, 192], sizes = [32, 64], strides = [1, 1]} : vector<32x256xf32> to vector<32x64xf32>
      %125 = arith.mulf %123, %124 : vector<32x64xf32>
      %126 = arith.addf %121, %125 : vector<32x64xf32>
      %c0_83 = arith.constant 0 : index
      %c0_84 = arith.constant 0 : index
      %127 = vector.load %arg11[%c0_83, %c0_84] : memref<32x64xf32, #tpu.memory_space<vmem>>, vector<32x64xf32>
      %128 = arith.addf %126, %127 : vector<32x64xf32>
      %129 = arith.negf %128 : vector<32x64xf32>
      %130 = math.exp %129 : vector<32x64xf32>
      %cst_85 = arith.constant 1.000000e+00 : f32
      %131 = vector.broadcast %cst_85 : f32 to vector<32x64xf32>
      %132 = arith.addf %131, %130 : vector<32x64xf32>
      %133 = arith.divf %131, %132 : vector<32x64xf32>
      %134 = vector.extract_strided_slice %133 {offsets = [0, 0], sizes = [32, 32], strides = [1, 1]} : vector<32x64xf32> to vector<32x32xf32>
      %135 = vector.extract_strided_slice %133 {offsets = [0, 32], sizes = [32, 32], strides = [1, 1]} : vector<32x64xf32> to vector<32x32xf32>
      %136 = arith.mulf %134, %arg18 : vector<32x32xf32>
      %c0_86 = arith.constant 0 : index
      %c0_87 = arith.constant 0 : index
      %c0_88 = arith.constant 0 : index
      %137 = vector.load %arg1[%c0_86, %c0_87, %c0_88] : memref<1x32x32xf32, #tpu.memory_space<vmem>>, vector<1x32x32xf32>
      %138 = vector.shape_cast %137 : vector<1x32x32xf32> to vector<32x32xf32>
      %cst_89 = arith.constant dense<0.000000e+00> : vector<32x32xf32>
      %139 = tpu.matmul %138, %136, %cst_89 {dimension_numbers = #tpu.dot_dimension_numbers<[1], [0], [0], [1], [0, 0, 1, 1], [], []>} : vector<32x32xf32>, vector<32x32xf32>, vector<32x32xf32> -> vector<32x32xf32>
      %140 = tpu.concatenate %136, %139 in 1 : vector<32x32xf32>, vector<32x32xf32> -> vector<32x64xf32>
      %141 = vector.extract_strided_slice %103 {offsets = [0, 256], sizes = [32, 128], strides = [1, 1]} : vector<32x384xf32> to vector<32x128xf32>
      %c0_90 = arith.constant 0 : index
      %c0_91 = arith.constant 0 : index
      %142 = vector.load %arg10[%c0_90, %c0_91] : memref<64x128xf32, #tpu.memory_space<vmem>>, vector<64x128xf32>
      %cst_92 = arith.constant dense<0.000000e+00> : vector<32x128xf32>
      %143 = tpu.matmul %140, %142, %cst_92 {dimension_numbers = #tpu.dot_dimension_numbers<[1], [0], [0], [1], [0, 0, 1, 1], [], []>} : vector<32x64xf32>, vector<64x128xf32>, vector<32x128xf32> -> vector<32x128xf32>
      %144 = arith.addf %141, %143 : vector<32x128xf32>
      %c0_93 = arith.constant 0 : index
      %c0_94 = arith.constant 0 : index
      %c0_95 = arith.constant 0 : index
      %145 = vector.load %arg2[%c0_93, %c0_94, %c0_95] : memref<4x32x64xf32, #tpu.memory_space<vmem>>, vector<1x32x64xf32>
      %146 = vector.shape_cast %145 : vector<1x32x64xf32> to vector<32x64xf32>
      %147 = vector.extract_strided_slice %146 {offsets = [0, 0], sizes = [32, 32], strides = [1, 1]} : vector<32x64xf32> to vector<32x32xf32>
      %148 = vector.extract_strided_slice %144 {offsets = [0, 0], sizes = [32, 32], strides = [1, 1]} : vector<32x128xf32> to vector<32x32xf32>
      %149 = arith.mulf %147, %148 : vector<32x32xf32>
      %c1_96 = arith.constant 1 : index
      %c0_97 = arith.constant 0 : index
      %c0_98 = arith.constant 0 : index
      %150 = vector.load %arg2[%c1_96, %c0_97, %c0_98] : memref<4x32x64xf32, #tpu.memory_space<vmem>>, vector<1x32x64xf32>
      %151 = vector.shape_cast %150 : vector<1x32x64xf32> to vector<32x64xf32>
      %152 = vector.extract_strided_slice %151 {offsets = [0, 0], sizes = [32, 32], strides = [1, 1]} : vector<32x64xf32> to vector<32x32xf32>
      %153 = vector.extract_strided_slice %144 {offsets = [0, 32], sizes = [32, 32], strides = [1, 1]} : vector<32x128xf32> to vector<32x32xf32>
      %154 = arith.mulf %152, %153 : vector<32x32xf32>
      %155 = arith.addf %149, %154 : vector<32x32xf32>
      %c2_99 = arith.constant 2 : index
      %c0_100 = arith.constant 0 : index
      %c0_101 = arith.constant 0 : index
      %156 = vector.load %arg2[%c2_99, %c0_100, %c0_101] : memref<4x32x64xf32, #tpu.memory_space<vmem>>, vector<1x32x64xf32>
      %157 = vector.shape_cast %156 : vector<1x32x64xf32> to vector<32x64xf32>
      %158 = vector.extract_strided_slice %157 {offsets = [0, 0], sizes = [32, 32], strides = [1, 1]} : vector<32x64xf32> to vector<32x32xf32>
      %159 = vector.extract_strided_slice %144 {offsets = [0, 64], sizes = [32, 32], strides = [1, 1]} : vector<32x128xf32> to vector<32x32xf32>
      %160 = arith.mulf %158, %159 : vector<32x32xf32>
      %161 = arith.addf %155, %160 : vector<32x32xf32>
      %c3_102 = arith.constant 3 : index
      %c0_103 = arith.constant 0 : index
      %c0_104 = arith.constant 0 : index
      %162 = vector.load %arg2[%c3_102, %c0_103, %c0_104] : memref<4x32x64xf32, #tpu.memory_space<vmem>>, vector<1x32x64xf32>
      %163 = vector.shape_cast %162 : vector<1x32x64xf32> to vector<32x64xf32>
      %164 = vector.extract_strided_slice %163 {offsets = [0, 0], sizes = [32, 32], strides = [1, 1]} : vector<32x64xf32> to vector<32x32xf32>
      %165 = vector.extract_strided_slice %144 {offsets = [0, 96], sizes = [32, 32], strides = [1, 1]} : vector<32x128xf32> to vector<32x32xf32>
      %166 = arith.mulf %164, %165 : vector<32x32xf32>
      %167 = arith.addf %161, %166 : vector<32x32xf32>
      %c0_105 = arith.constant 0 : index
      %c0_106 = arith.constant 0 : index
      %168 = vector.load %arg12[%c0_105, %c0_106] : memref<32x32xf32, #tpu.memory_space<vmem>>, vector<32x32xf32>
      %169 = arith.addf %167, %168 : vector<32x32xf32>
      %170 = math.tanh %169 : vector<32x32xf32>
      %171 = arith.mulf %135, %arg18 : vector<32x32xf32>
      %cst_107 = arith.constant 1.000000e+00 : f32
      %172 = vector.broadcast %cst_107 : f32 to vector<32x32xf32>
      %173 = arith.subf %172, %135 : vector<32x32xf32>
      %174 = arith.mulf %173, %170 : vector<32x32xf32>
      %175 = arith.addf %171, %174 : vector<32x32xf32>
      scf.yield %93, %175 : vector<32x32xf32>, vector<32x32xf32>
    }
    %c8_i32_0 = arith.constant 8 : i32
    %c0 = arith.constant 0 : index
    %c0_1 = arith.constant 0 : index
    %3 = vector.load %arg13[%c0, %c0_1] : memref<32x4xf32, #tpu.memory_space<vmem>>, vector<32x4xf32>
    %cst_2 = arith.constant dense<0.000000e+00> : vector<32x4xf32>
    %4 = tpu.matmul %2#1, %3, %cst_2 {dimension_numbers = #tpu.dot_dimension_numbers<[1], [0], [0], [1], [0, 0, 1, 1], [], []>} : vector<32x32xf32>, vector<32x4xf32>, vector<32x4xf32> -> vector<32x4xf32>
    %c0_3 = arith.constant 0 : index
    %c0_4 = arith.constant 0 : index
    %5 = vector.load %arg14[%c0_3, %c0_4] : memref<1x4xf32, #tpu.memory_space<vmem>>, vector<1x4xf32>
    %6 = vector.broadcast %5 : vector<1x4xf32> to vector<32x4xf32>
    %7 = arith.addf %4, %6 : vector<32x4xf32>
    %c0_5 = arith.constant 0 : index
    %c0_6 = arith.constant 0 : index
    %8 = vector.load %arg15[%c0_5, %c0_6] : memref<32x4xf32, #tpu.memory_space<vmem>>, vector<32x4xf32>
    tpu.vector_store %arg15[%c0_5, %c0_6], %7 {strides = array<i32>} : memref<32x4xf32, #tpu.memory_space<vmem>>, vector<32x4xf32>,
    return
  }
}

</mosaic_0001>

<bundles_post_ra>
// kernel: agcrn_forward_pallas.1
= control target key start
LH: loop header
LB: loop body
LE: loop exit
PB: predicated region body
PF: predicated region fallthrough
CT: control target
= control target key end

     0   :  { %v2019_v0 = vmov 0.0   ;;  %v2021_v1 = vmov 0.0   ;;  %v2023_v2 = vmov 0.0   ;;  %v2025_v3 = vmov 0.0   ;;  %s2035_s18 = smov 0   ;;  %s2988_s0 = inlined_call_operand.vmem [shape: f32[8,32,2], index: 0, kind: input, shape index: {}]   ;;  %s2989_s1 = inlined_call_operand.vmem [shape: f32[1,32,32], index: 1, kind: input, shape index: {}]   ;;  %s2990_s2 = inlined_call_operand.vmem [shape: f32[4,32,64], index: 2, kind: input, shape index: {}]   ;;  %s2991_s3 = inlined_call_operand.vmem [shape: f32[4,384], index: 3, kind: input, shape index: {}]   ;;  %s2992_s4 = inlined_call_operand.vmem [shape: f32[64,256], index: 4, kind: input, shape index: {}]   ;;  %s2993_s5 = inlined_call_operand.vmem [shape: f32[64,128], index: 5, kind: input, shape index: {}]   ;;  %s2994_s6 = inlined_call_operand.vmem [shape: f32[32,64], index: 6, kind: input, shape index: {}]   ;;  %s2995_s7 = inlined_call_operand.vmem [shape: f32[32,32], index: 7, kind: input, shape index: {}]   ;;  %s2996_s8 = inlined_call_operand.vmem [shape: f32[64,384], index: 8, kind: input, shape index: {}]   ;;  %s2997_s9 = inlined_call_operand.vmem [shape: f32[64,256], index: 9, kind: input, shape index: {}]   ;;  %s2998_s10 = inlined_call_operand.vmem [shape: f32[64,128], index: 10, kind: input, shape index: {}]   ;;  %s2999_s11 = inlined_call_operand.vmem [shape: f32[32,64], index: 11, kind: input, shape index: {}]   ;;  %s3000_s12 = inlined_call_operand.vmem [shape: f32[32,32], index: 12, kind: input, shape index: {}]   ;;  %s3001_s13 = inlined_call_operand.vmem [shape: f32[32,4], index: 13, kind: input, shape index: {}]   ;;  %s3002_s14 = inlined_call_operand.vmem [shape: f32[1,4], index: 14, kind: input, shape index: {}]   ;;  %s3003_s15 = inlined_call_operand.vmem [shape: f32[32,4], index: 15, kind: output, shape index: {}]  }
   0x1   :  { %v2027_v4 = vmov 0.0   ;;  %v2029_v5 = vmov 0.0   ;;  %v2031_v6 = vmov 0.0   ;;  %v2033_v7 = vmov 0.0  }
   0x2 LB: > { %s1934_s19 = smov 96   ;;  %s1602_s20 = sshll.u32 %s1932_s18, 5  ;;  %v2084_v12 = vld [vmem:[%s2989_s1] sm:$0xff]  ;;  %vm74_vm0 = vcmask 261120   ;;  %v2095_v13 = vld [vmem:[%s2989_s1 + $0x8] sm:$0xff]  ;;  %v2102_v14 = vld [vmem:[%s2989_s1 + $0x10] sm:$0xff]  ;;  %s1932_s18 = sphi %s2035_s18, %s55_s18   ;;  %v1928_v7 = vphi %v2033_v7, %v2507_v7   ;;  %v1924_v6 = vphi %v2031_v6, %v2482_v6   ;;  %v1920_v5 = vphi %v2029_v5, %v2492_v5   ;;  %v1916_v4 = vphi %v2027_v4, %v2498_v4   ;;  %v1912_v3 = vphi %v2025_v3, %v3013_v3   ;;  %v1908_v2 = vphi %v2023_v2, %v3012_v2   ;;  %v1904_v1 = vphi %v2021_v1, %v3011_v1   ;;  %v1900_v0 = vphi %v2019_v0, %v3010_v0  }
   0x3   : > { %147 = vrot.lane.b32.xlu0 %v1916_v4, %s1934_s19  ;;  %143 = vrot.lane.b32.xlu1 %v1924_v6, %s1934_s19  ;;  %s65_s23 = scalar_lea.vmem %s2988_s0, %s1602_s20  ;;  %v2109_v15 = vld [vmem:[%s2989_s1 + $0x18] sm:$0xff]  ;;  %s1935_s17 = smov 2   ;;  %v202_v25 = vld [vmem:[%s2991_s3] sm:$0xff]  ;;  %vm132_vm1 = vcmask 15360   ;;  %vm225_vm2 = vcmask 1043456   ;;  %vm212_vm3 = vcmask 31744  }
   0x4   : > { %v2072_v8 = vld [vmem:[%s65_s23 + $0x18] sm:$0xff]  ;;  %v2074_v9 = vld [vmem:[%s65_s23 + $0x10] sm:$0xff]  ;;  %v2077_v10 = vld [vmem:[%s65_s23 + $0x8] sm:$0xff]  ;;  %206 = vst [vmem:[#allocation1] ss:$2 sm:$0xff] %v202_v25  ;;  %s1936_s24 = smov 32  }
   0x5   : > { %99 = vmatpush.msra.mxu0 %v2072_v8  ;;  %v66_v11 = vld [vmem:[%s65_s23] sm:$0xff]  ;;  %v203_v26 = vld [vmem:[%s2991_s3 + $0x8] sm:$0xf]  ;;  %v333_v38 = vld [vmem:[%s2992_s4 + $0x70] sm:$0xff]  ;;  %vm335_vm4 = vcmask 523264   ;;  %s1937_s20 = smov 64  }
   0x6   : > { %208 = vst [vmem:[#allocation1 + $0x10] ss:$2 sm:$0xff] %v203_v26  ;;  %v334_v39 = vld [vmem:[%s2992_s4 + $0x78] sm:$0xff]  ;;  %v331_v40 = vld [vmem:[%s2992_s4 + $0x60] sm:$0xff]  ;;  %v332_v41 = vld [vmem:[%s2992_s4 + $0x68] sm:$0xff]  ;;  %s55_s18 = sadd.s32 1, %s1932_s18  }
   0x7   : > { %100 = vmatpush.msra.mxu0 %v2074_v9  ;;  %v329_v43 = vld [vmem:[%s2992_s4 + $0x50] sm:$0xff]  ;;  %v330_v44 = vld [vmem:[%s2992_s4 + $0x58] sm:$0xff]  ;;  %v327_v46 = vld [vmem:[%s2992_s4 + $0x40] sm:$0xff]  ;;  %p52_p0 = scmp.ge.s32.totalorder %s55_s18, 8  }
   0x8   : > { %v328_v47 = vld [vmem:[%s2992_s4 + $0x48] sm:$0xff]  ;;  %v325_v48 = vld [vmem:[%s2992_s4 + $0x30] sm:$0xff]  ;;  %v326_v49 = vld [vmem:[%s2992_s4 + $0x38] sm:$0xff]  ;;  %s1938_s23 = smov (%p52_p0), 96  }
   0x9   : > { %101 = vmatpush.msra.mxu0 %v2077_v10  ;;  %v323_v50 = vld [vmem:[%s2992_s4 + $0x20] sm:$0xff]  ;;  %v324_v51 = vld [vmem:[%s2992_s4 + $0x28] sm:$0xff]  ;;  %v321_v52 = vld [vmem:[%s2992_s4 + $0x10] sm:$0xff] }
   0xa   : > { %v322_v53 = vld [vmem:[%s2992_s4 + $0x18] sm:$0xff]  ;;  %v319_v55 = vld [vmem:[%s2992_s4] sm:$0xff]  ;;  %v320_v56 = vld [vmem:[%s2992_s4 + $0x8] sm:$0xff] }
   0xb   : > { %145 = vrot.lane.b32.xlu0 %v1920_v5, %s1934_s19  ;;  %141 = vrot.lane.b32.xlu1 %v1928_v7, %s1934_s19  ;;  %v209_v31 = vld.sshfl [vmem:[#allocation1] sm:$0xff pattern:$0x75316420]  ;;  %v210_v32 = vld.sshfl [vmem:[#allocation1 + $0x8] sm:$0xff pattern:$0x75316420] }
   0xc   : > { %102 = vmatpush.msra.mxu0 %v66_v11  ;;  %1611 = vmatpush.msk.msra.mxu2 %vm225_vm2, %v209_v31 }
   0xd   : > { %1603 = vmatmul.msk.f32.vlgmr.msra.gmra.mxu0 %vm74_vm0, %v2084_v12  ;;  %v211_v33 = vld.sshfl [vmem:[#allocation1 + $0x10] sm:$0xff pattern:$0x75316420]  ;;  %1702 = vmatpush.msk.msra.mxu3 %vm225_vm2, %v210_v32 }
   0xe   : > { %1621 = vmatpush.msk.msrb.mxu0 %vm225_vm2, %v211_v33  ;;  %1703 = vmatpush.msk.msrb.mxu2 %vm225_vm2, %v211_v33 }
   0xf   : > { %356 = vmatpush.msrb.mxu3 %v333_v38 }
  0x10   : > { %385 = vmatpush.msra.mxu0 %v334_v39 }
  0x11   : > { %357 = vmatpush.msrb.mxu3 %v331_v40 }
  0x12   : > { %386 = vmatpush.msra.mxu0 %v332_v41 }
  0x13   : > { %358 = vmatpush.msrb.mxu3 %v329_v43  ;;  %v2246_v43 = vld [vmem:[%s2990_s2 + $0x8] sm:$0xff] }
  0x14   : > { %387 = vmatpush.msra.mxu0 %v330_v44  ;;  %v2251_v44 = vld [vmem:[%s2990_s2 + $0x28] sm:$0xff] }
  0x15   : > { %1604 = vmatmul.msk.f32.gmra.mxu0 %vm74_vm0, %v2095_v13  ;;  %359 = vmatpush.msrb.mxu3 %v327_v46 }
  0x16   : > { %388 = vmatpush.msra.mxu0 %v328_v47 }
  0x17   : > { %360 = vmatpush.msrb.mxu3 %v325_v48 }
  0x18   : > { %389 = vmatpush.msra.mxu0 %v326_v49 }
  0x19   : > { %361 = vmatpush.msrb.mxu3 %v323_v50 }
  0x1a   : > { %390 = vmatpush.msra.mxu0 %v324_v51 }
  0x1b   : > { %362 = vmatpush.msrb.mxu3 %v321_v52  ;;  %v2264_v52 = vld [vmem:[%s2990_s2] sm:$0xff] }
  0x1c   : > { %391 = vmatpush.msra.mxu0 %v322_v53  ;;  %v2269_v53 = vld [vmem:[%s2990_s2 + $0x20] sm:$0xff] }
  0x1d   : > { %1605 = vmatmul.msk.f32.gmra.mxu0 %vm74_vm0, %v2102_v14  ;;  %363 = vmatpush.msrb.mxu3 %v319_v55 }
  0x1e   : > { %392 = vmatpush.msra.mxu0 %v320_v56 }
  0x25   : > { %1606 = vmatmul.msk.f32.gmra.mxu0 %vm74_vm0, %v2109_v15 }
  0x75   : > { %v2113_v16 = vpop.permute.xlu0 %147  ;;  %v2115_v17 = vpop.permute.xlu1 %143 }
  0x76   : > { %165 = vmatpush.msra.mxu1 %v2113_v16 }
  0x7d   : > { %v2118_v18 = vpop.permute.xlu0 %145  ;;  %v2121_v19 = vpop.permute.xlu1 %141 }
  0x7e   : > { %166 = vmatpush.msra.mxu1 %v2118_v18 }
  0x80   : > { %167 = vmatpush.msra.mxu1 %v2115_v17 }
  0x82   : > { %168 = vmatpush.msra.mxu1 %v2121_v19 }
  0x83   : > { %1607 = vmatmul.msk.f32.vlgmr.msra.gmra.mxu1 %vm74_vm0, %v2084_v12 }
  0x84   : > { %1616 = vmatpush.msk.msrb.mxu1 %vm225_vm2, %v210_v32 }
  0x8a   : > { %v104_v20 = vpop.f32.mrf.mxu0 }
  0x8b   : > { %1608 = vmatmul.msk.f32.gmra.mxu1 %vm74_vm0, %v2095_v13  ;;  %120 = vrot.lane.b32.xlu0 %v104_v20, %s1935_s17 }
  0x92   : > { %v107_v21 = vpop.f32.mrf.mxu0 }
  0x93   : > { %1609 = vmatmul.msk.f32.gmra.mxu1 %vm74_vm0, %v2102_v14 }
  0x9a   : > { %v110_v22 = vpop.f32.mrf.mxu0 }
  0x9b   : > { %1610 = vmatmul.msk.f32.gmra.mxu1 %vm74_vm0, %v2109_v15  ;;  %124 = vrot.lane.b32.xlu2 %v110_v22, %s1935_s17 }
  0xa2   : > { %v113_v23 = vpop.f32.mrf.mxu0 }
  0xa3   : > { %126 = vrot.lane.b32.xlu2 %v113_v23, %s1935_s17 }
  0xab   : > { %122 = vrot.lane.b32.xlu2 %v107_v21, %s1935_s17 }
  0xf5   : > { %v125_v24 = vpop.permute.xlu2 %124 }
  0xf6   : > { %v135_v34 = vsel %vm132_vm1, %v2074_v9, %v125_v24 }
  0xf7   : > { %1619 = vmatmul.msk.f32.vlgmr.msra.gmra.mxu3 %vm212_vm3, %v135_v34 }
  0xfd   : > { %v121_v27 = vpop.permute.xlu0 %120  ;;  %v127_v30 = vpop.permute.xlu2 %126 }
  0xfe   : > { %v133_v29 = vsel %vm132_vm1, %v66_v11, %v121_v27  ;;  %v136_v42 = vsel %vm132_vm1, %v2072_v8, %v127_v30 }
  0xff   : > { %1612 = vmatmul.msk.f32.vlgmr.msra.gmra.mxu2 %vm212_vm3, %v133_v29  ;;  %1617 = vmatmul.msk.f32.vlgmr.msrb.gmra.mxu1 %vm212_vm3, %v133_v29 }
 0x100   : > { %v170_v28 = vpop.f32.mrf.mxu1  ;;  %1622 = vmatmul.msk.f32.vlgmr.msrb.gmra.mxu0 %vm212_vm3, %v133_v29  ;;  %1620 = vmatmul.msk.f32.gmra.mxu3 %vm212_vm3, %v136_v42 }
 0x101   : > { %186 = vrot.lane.b32.xlu1 %v170_v28, %s1936_s24 }
 0x105   : > { %v123_v36 = vpop.permute.xlu2 %122 }
 0x106   : > { %v134_v37 = vsel %vm132_vm1, %v2077_v10, %v123_v36 }
 0x107   : > { %1613 = vmatmul.msk.f32.gmra.mxu2 %vm212_vm3, %v134_v37  ;;  %1618 = vmatmul.msk.f32.gmra.mxu1 %vm212_vm3, %v134_v37 }
 0x108   : > { %v173_v35 = vpop.f32.mrf.mxu1  ;;  %1623 = vmatmul.msk.f32.gmra.mxu0 %vm212_vm3, %v134_v37 }
 0x109   : > { %188 = vrot.lane.b32.xlu0 %v173_v35, %s1936_s24 }
 0x10f   : > { %1614 = vmatmul.msk.f32.gmra.mxu2 %vm212_vm3, %v135_v34 }
 0x110   : > { %v176_v45 = vpop.f32.mrf.mxu1 }
 0x111   : > { %190 = vrot.lane.b32.xlu1 %v176_v45, %s1936_s24  ;;  %v2256_v45 = vld [vmem:[%s2990_s2 + $0x48] sm:$0xff] }
 0x117   : > { %1615 = vmatmul.msk.f32.gmra.mxu2 %vm212_vm3, %v136_v42 }
 0x118   : > { %v179_v54 = vpop.f32.mrf.mxu1 }
 0x119   : > { %192 = vrot.lane.b32.xlu2 %v179_v54, %s1936_s24  ;;  %v2274_v54 = vld [vmem:[%s2990_s2 + $0x40] sm:$0xff] }
 0x11f   : > { %1624 = vmatmul.msk.f32.vlgmr.msrb.gmra.mxu2 %vm212_vm3, %v135_v34 }
 0x127   : > { %1625 = vmatmul.msk.f32.gmra.mxu2 %vm212_vm3, %v136_v42 }
 0x173   : > { %v187_v57 = vpop.permute.xlu1 %186  ;;  %v193_v63 = vpop.permute.xlu2 %192 }
 0x174   : > { %v198_v58 = vsel %vm74_vm0, %v2121_v19, %v187_v57  ;;  %v201_v8 = vsel %vm74_vm0, %v2113_v16, %v193_v63  ;;  %v2292_v63 = vld [vmem:[%s2990_s2 + $0x50] sm:$0xff] }
 0x175   : > { %1626 = vmatmul.msk.f32.vlgmr.msrb.gmra.mxu3 %vm335_vm4, %v198_v58  ;;  %1630 = vmatmul.msk.f32.vlgmr.msra.gmra.mxu0 %vm335_vm4, %v198_v58 }
 0x17a   : > { %v284_v10 = vpop.f32.mrf.mxu3 }
 0x17b   : > { %v189_v59 = vpop.permute.xlu0 %188 }
 0x17c   : > { %v199_v60 = vsel %vm74_vm0, %v2115_v17, %v189_v59  ;;  %v278_v36 = vpop.f32.mrf.mxu1 }
 0x17d   : > { %1627 = vmatmul.msk.f32.gmra.mxu3 %vm335_vm4, %v199_v60  ;;  %1631 = vmatmul.msk.f32.gmra.mxu0 %vm335_vm4, %v199_v60  ;;  %v2231_v9 = vpop.f32.mrf.mxu0 }
 0x182   : > { %v249_v22 = vpop.f32.mrf.mxu2 }
 0x183   : > { %v191_v61 = vpop.permute.xlu1 %190  ;;  %v287_v20 = vpop.f32.mrf.mxu3 }
 0x184   : > { %v200_v62 = vsel %vm74_vm0, %v2118_v18, %v191_v61  ;;  %v281_v41 = vpop.f32.mrf.mxu1  ;;  %v2282_v61 = vld [vmem:[%s2990_s2 + $0x10] sm:$0xff] }
 0x185   : > { %1628 = vmatmul.msk.f32.gmra.mxu3 %vm335_vm4, %v200_v62  ;;  %1632 = vmatmul.msk.f32.gmra.mxu0 %vm335_vm4, %v200_v62  ;;  %v2233_v11 = vpop.f32.mrf.mxu0  ;;  %v2287_v62 = vld [vmem:[%s2990_s2 + $0x30] sm:$0xff] }
 0x18a   : > { %v252_v26 = vpop.f32.mrf.mxu2 }
 0x18d   : > { %1629 = vmatmul.msk.f32.gmra.mxu3 %vm335_vm4, %v201_v8  ;;  %1633 = vmatmul.msk.f32.gmra.mxu0 %vm335_vm4, %v201_v8 }
 0x192   : > { %v255_v30 = vpop.f32.mrf.mxu2 }
 0x19a   : > { %v258_v39 = vpop.f32.mrf.mxu2 }
 0x1f2   : > { %v394_v21 = vpop.f32.mrf.mxu0 }
 0x1f3   : > { %v407_v38 = vadd.f32 %v394_v21, %v278_v36  ;;  %v2299_v21 = vld [vmem:[%s2990_s2 + $0x70] sm:$0xff] }
 0x1f5   : > { %v456_v58 = vmul.f32 %v2274_v54, %v407_v38 }
 0x1f8   : > { %v365_v23 = vpop.f32.mrf.mxu3 }
 0x1f9   : > { %v406_v24 = vadd.f32 %v365_v23, %v249_v22 }
 0x1fa   : > { %v397_v25 = vpop.f32.mrf.mxu0 }
 0x1fb   : > { %431 = vrot.lane.b32.xlu1 %v406_v24, %s1937_s20  ;;  %v409_v42 = vadd.f32 %v397_v25, %v281_v41  ;;  %v418_v56 = vmul.f32 %v2264_v52, %v406_v24 }
 0x1fd   : > { %v457_v49 = vmul.f32 %v2256_v45, %v409_v42 }
 0x200   : > { %v368_v27 = vpop.f32.mrf.mxu3 }
 0x201   : > { %v408_v28 = vadd.f32 %v368_v27, %v252_v26 }
 0x202   : > { %v400_v29 = vpop.f32.mrf.mxu0 }
 0x203   : > { %433 = vrot.lane.b32.xlu2 %v408_v28, %s1937_s20  ;;  %v411_v32 = vadd.f32 %v400_v29, %v284_v10  ;;  %v419_v47 = vmul.f32 %v2246_v43, %v408_v28  ;;  %v495_v28 = vld [vmem:[%s2994_s6 + $0x10] sm:$0xff]  ;;  %v2309_v29 = vld [vmem:[%s2990_s2 + $0x60] sm:$0xff] }
 0x205   : > { %v458_v24 = vmul.f32 %v2292_v63, %v411_v32 }
 0x208   : > { %v371_v31 = vpop.f32.mrf.mxu3 }
 0x209   : > { %v410_v33 = vadd.f32 %v371_v31, %v255_v30  ;;  %v2314_v31 = vld [vmem:[%s2990_s2 + $0x18] sm:$0xff] }
 0x20a   : > { %v403_v34 = vpop.f32.mrf.mxu0 }
 0x20b   : > { %v413_v35 = vadd.f32 %v403_v34, %v287_v20  ;;  %477 = vrot.lane.b32.xlu2 %v411_v32, %s1937_s20  ;;  %435 = vrot.lane.b32.xlu1 %v410_v33, %s1937_s20  ;;  %v420_v10 = vmul.f32 %v2282_v61, %v410_v33  ;;  %v2319_v33 = vld [vmem:[%s2990_s2 + $0x38] sm:$0xff] }
 0x20d   : > { %479 = vrot.lane.b32.xlu0 %v413_v35, %s1937_s20 }
 0x210   : > { %v374_v37 = vpop.f32.mrf.mxu3 }
 0x211   : > { %v412_v40 = vadd.f32 %v374_v37, %v258_v39  ;;  %v2325_v37 = vld [vmem:[%s2990_s2 + $0x58] sm:$0xff] }
 0x213   : > { %473 = vrot.lane.b32.xlu1 %v407_v38, %s1937_s20  ;;  %v493_v38 = vld [vmem:[%s2994_s6] sm:$0xff]  ;;  %v421_v41 = vmul.f32 %v2314_v31, %v412_v40 }
 0x215   : > { %437 = vrot.lane.b32.xlu0 %v412_v40, %s1937_s20  ;;  %v496_v40 = vld [vmem:[%s2994_s6 + $0x18] sm:$0xff] }
 0x21d   : > { %475 = vrot.lane.b32.xlu0 %v409_v42, %s1937_s20 }
 0x25d   : > { %v434_v46 = vpop.permute.xlu2 %433 }
 0x25e   : > { %v444_v48 = vmul.f32 %v2251_v44, %v434_v46 }
 0x260   : > { %v448_v50 = vadd.f32 %v444_v48, %v419_v47  ;;  %v2335_v48 = vld [vmem:[%s2990_s2 + $0x78] sm:$0xff] }
 0x262   : > { %v461_v51 = vadd.f32 %v457_v49, %v448_v50  ;;  %v459_v49 = vmul.f32 %v2325_v37, %v413_v35 }
 0x265   : > { %v478_v22 = vpop.permute.xlu2 %477 }
 0x266   : > { %v487_v26 = vmul.f32 %v2299_v21, %v478_v22 }
 0x26d   : > { %v432_v55 = vpop.permute.xlu1 %431 }
 0x26e   : > { %v443_v57 = vmul.f32 %v2269_v53, %v432_v55 }
 0x270   : > { %v447_v59 = vadd.f32 %v443_v57, %v418_v56 }
 0x272   : > { %v460_v60 = vadd.f32 %v456_v58, %v447_v59  ;;  %v2345_v59 = vld [vmem:[%s2990_s2 + $0x68] sm:$0xff] }
 0x27d   : > { %v436_v8 = vpop.permute.xlu1 %435 }
 0x27e   : > { %v445_v20 = vmul.f32 %v2287_v62, %v436_v8 }
 0x27f   : > { %v480_v23 = vpop.permute.xlu0 %479 }
 0x280   : > { %v449_v25 = vadd.f32 %v445_v20, %v420_v10  ;;  %v488_v56 = vmul.f32 %v2335_v48, %v480_v23  ;;  %v494_v23 = vld [vmem:[%s2994_s6 + $0x8] sm:$0xff] }
 0x282   : > { %v462_v27 = vadd.f32 %v458_v24, %v449_v25 }
 0x284   : > { %v491_v30 = vadd.f32 %v487_v26, %v462_v27 }
 0x285   : > { %v474_v32 = vpop.permute.xlu1 %473 }
 0x286   : > { %v499_v34 = vadd.f32 %v495_v28, %v491_v30  ;;  %v485_v36 = vmul.f32 %v2309_v29, %v474_v32 }
 0x287   : > { %v438_v39 = vpop.permute.xlu0 %437 }
 0x288   : > { %v1648_v42 = vmul.f32 -1.442695, %v499_v34  ;;  %v489_v46 = vadd.f32 %v485_v36, %v460_v60  ;;  %v446_v47 = vmul.f32 %v2319_v33, %v438_v39 }
 0x28a   : > { %1793 = vpow2.f32 %v1648_v42  ;;  %v497_v50 = vadd.f32 %v493_v38, %v489_v46  ;;  %v450_v55 = vadd.f32 %v446_v47, %v421_v41 }
 0x28c   : > { %v1646_v57 = vmul.f32 -1.442695, %v497_v50  ;;  %v463_v58 = vadd.f32 %v459_v49, %v450_v55 }
 0x28e   : > { %1795 = vpow2.f32 %v1646_v57  ;;  %v492_v60 = vadd.f32 %v488_v56, %v463_v58 }
 0x28f   : > { %v476_v8 = vpop.permute.xlu0 %475 }
 0x290   : > { %v1794_v35 = vpop.eup %1793  ;;  %v500_v10 = vadd.f32 %v496_v40, %v492_v60  ;;  %v486_v20 = vmul.f32 %v2345_v59, %v476_v8 }
 0x291   : > { %v515_v22 = vadd.f32 1.0, %v1794_v35 }
 0x292   : > { %v1649_v24 = vmul.f32 -1.442695, %v500_v10  ;;  %v490_v25 = vadd.f32 %v486_v20, %v461_v51 }
 0x293   : > { %1797 = vrcp.f32 %v515_v22  ;;  %v556_v55 = vand.u32 2147483647, %v515_v22  ;;  %v558_v57 = vand.u32 2147483648, %v515_v22  ;;  %vm552_vm6 = vweird.f32 %v515_v22 }
 0x294   : > { %v1796_v26 = vpop.eup %1795  ;;  %1799 = vpow2.f32 %v1649_v24  ;;  %v498_v27 = vadd.f32 %v494_v23, %v490_v25 }
 0x295   : > { %v2351_v28 = vadd.f32 1.0, %v1796_v26  ;;  %vm2355_vm7 = vcmp.eq.f32.partialorder %v556_v55, 8.507059e+37  ;;  %v559_v24 = vor.u32 1.1754944e-38, %v558_v57 }
 0x296   : > { %v1647_v30 = vmul.f32 -1.442695, %v498_v27 }
 0x297   : > { %1801 = vrcp.f32 %v2351_v28  ;;  %vm522_vm11 = vweird.f32 %v2351_v28  ;;  %v526_v27 = vand.u32 2147483647, %v2351_v28 }
 0x298   : > { %1803 = vpow2.f32 %v1647_v30 }
 0x299   : > { %v1798_v32 = vpop.eup %1797 }
 0x29a   : > { %v1800_v34 = vpop.eup %1799  ;;  %v548_v36 = vmul.f32 %v1798_v32, %v515_v22  ;;  %vm553_vm5 = vweird.f32 %v1798_v32 }
 0x29b   : > { %v516_v38 = vadd.f32 1.0, %v1800_v34  ;;  %vm2359_vm10 = vmor %vm552_vm6, %vm553_vm5 }
 0x29c   : > { %v549_v42 = vsub.f32 1.0, %v548_v36 }
 0x29d   : > { %v1802_v39 = vpop.eup %1801  ;;  %1805 = vrcp.f32 %v516_v38  ;;  %v571_v35 = vand.u32 2147483647, %v516_v38  ;;  %v573_v10 = vand.u32 2147483648, %v516_v38  ;;  %vm567_vm9 = vweird.f32 %v516_v38 }
 0x29e   : > { %v1804_v41 = vpop.eup %1803  ;;  %v518_v51 = vmul.f32 %v1802_v39, %v2351_v28  ;;  %v550_v47 = vmul.f32 %v1798_v32, %v549_v42  ;;  %vm523_vm12 = vweird.f32 %v1802_v39 }
 0x29f   : > { %v514_v46 = vadd.f32 1.0, %v1804_v41  ;;  %vm572_vm14 = vcmp.eq.f32.partialorder %v571_v35, 8.507059e+37  ;;  %v574_v41 = vor.u32 1.1754944e-38, %v573_v10  ;;  %vm524_vm1 = vmor %vm522_vm11, %vm523_vm12 }
 0x2a0   : > { %v519_v49 = vsub.f32 1.0, %v518_v51  ;;  %v551_v40 = vadd.f32 %v1798_v32, %v550_v47 }
 0x2a1   : > { %1807 = vrcp.f32 %v514_v46  ;;  %v543_v42 = vand.u32 2147483648, %v514_v46  ;;  %vm537_vm2 = vweird.f32 %v514_v46 }
 0x2a2   : > { %v520_v60 = vmul.f32 %v1802_v39, %v519_v49  ;;  %v555_v22 = vsel %vm2359_vm10, %v1798_v32, %v551_v40  ;;  %v541_v49 = vand.u32 2147483647, %v514_v46 }
 0x2a3   : > { %v1806_v50 = vpop.eup %1805 }
 0x2a4   : > { %v563_v56 = vmul.f32 %v1806_v50, %v516_v38  ;;  %vm568_vm8 = vweird.f32 %v1806_v50  ;;  %v521_v36 = vadd.f32 %v1802_v39, %v520_v60  ;;  %v528_v38 = vand.u32 2147483648, %v2351_v28 }
 0x2a5   : > { %vm569_vm13 = vmor %vm567_vm9, %vm568_vm8  ;;  %vm542_vm6 = vcmp.eq.f32.partialorder %v541_v49, 8.507059e+37  ;;  %v313_v49 = vpop.f32.mrf.mxu2 }
 0x2a6   : > { %v564_v58 = vsub.f32 1.0, %v563_v56  ;;  %v2372_v56 = vsel %vm2355_vm7, %v559_v24, %v555_v22  ;;  %v529_v40 = vor.u32 1.1754944e-38, %v528_v38  ;;  %vm527_vm7 = vcmp.eq.f32.partialorder %v526_v27, 8.507059e+37  ;;  %v631_v24 = vld [vmem:[%s2993_s5 + $0x8] sm:$0xff] }
 0x2a7   : > { %v1808_v8 = vpop.eup %1807  ;;  %v579_v60 = vmul.f32 %v2372_v56, %v2118_v18  ;;  %v636_v18 = vld [vmem:[%s2993_s5 + $0x30] sm:$0xff] }
 0x2a8   : > { %v565_v23 = vmul.f32 %v1806_v50, %v564_v58  ;;  %v533_v25 = vmul.f32 %v1808_v8, %v514_v46  ;;  %vm538_vm15 = vweird.f32 %v1808_v8  ;;  %v525_v58 = vsel %vm524_vm1, %v1802_v39, %v521_v36  ;;  %v634_v46 = vld [vmem:[%s2993_s5 + $0x20] sm:$0xff] }
 0x2a9   : > { %vm539_vm5 = vmor %vm537_vm2, %vm538_vm15  ;;  %v2383_v28 = vsel %vm527_vm7, %v529_v40, %v525_v58 }
 0x2aa   : > { %v566_v30 = vadd.f32 %v1806_v50, %v565_v23  ;;  %v534_v34 = vsub.f32 1.0, %v533_v25  ;;  %v577_v39 = vmul.f32 %v2383_v28, %v2121_v19  ;;  %v635_v19 = vld [vmem:[%s2993_s5 + $0x28] sm:$0xff]  ;;  %v632_v23 = vld [vmem:[%s2993_s5 + $0x10] sm:$0xff] }
 0x2ac   : > { %v570_v51 = vsel %vm569_vm13, %v1806_v50, %v566_v30  ;;  %v535_v47 = vmul.f32 %v1808_v8, %v534_v34  ;;  %v544_v50 = vor.u32 1.1754944e-38, %v543_v42  ;;  %v630_v30 = vld [vmem:[%s2993_s5] sm:$0xff] }
 0x2ad   : > { %v2368_v55 = vsel %vm572_vm14, %v574_v41, %v570_v51 }
 0x2ae   : > { %v580_v32 = vmul.f32 %v2368_v55, %v2113_v16  ;;  %v536_v57 = vadd.f32 %v1808_v8, %v535_v47 }
 0x2b0   : > { %593 = vmatpush.msra.mxu1 %v580_v32  ;;  %v540_v35 = vsel %vm539_vm5, %v1808_v8, %v536_v57  ;;  %v633_v8 = vld [vmem:[%s2993_s5 + $0x18] sm:$0xff]  ;;  %v316_v57 = vpop.f32.mrf.mxu2 }
 0x2b1   : > { %v2381_v10 = vsel %vm542_vm6, %v544_v50, %v540_v35 }
 0x2b2   : > { %594 = vmatpush.msra.mxu1 %v579_v60  ;;  %v578_v16 = vmul.f32 %v2381_v10, %v2115_v17  ;;  %v637_v17 = vld [vmem:[%s2993_s5 + $0x38] sm:$0xff] }
 0x2b3   : > { %658 = vmatpush.msra.mxu2 %v637_v17 }
 0x2b4   : > { %595 = vmatpush.msra.mxu1 %v578_v16 }
 0x2b5   : > { %659 = vmatpush.msra.mxu2 %v636_v18 }
 0x2b6   : > { %596 = vmatpush.msra.mxu1 %v577_v39 }
 0x2b7   : > { %1650 = vmatmul.msk.f32.vlgmr.msra.gmra.mxu1 %vm74_vm0, %v2084_v12  ;;  %660 = vmatpush.msra.mxu2 %v635_v19 }
 0x2b9   : > { %661 = vmatpush.msra.mxu2 %v634_v46 }
 0x2bb   : > { %662 = vmatpush.msra.mxu2 %v633_v8 }
 0x2bd   : > { %663 = vmatpush.msra.mxu2 %v632_v23 }
 0x2bf   : > { %1651 = vmatmul.msk.f32.gmra.mxu1 %vm74_vm0, %v2095_v13  ;;  %664 = vmatpush.msra.mxu2 %v631_v24 }
 0x2c1   : > { %665 = vmatpush.msra.mxu2 %v630_v30 }
 0x2c7   : > { %1652 = vmatmul.msk.f32.gmra.mxu1 %vm74_vm0, %v2102_v14 }
 0x2cf   : > { %1653 = vmatmul.msk.f32.gmra.mxu1 %vm74_vm0, %v2109_v15 }
 0x334   : > { %v598_v20 = vpop.f32.mrf.mxu1 }
 0x335   : > { %614 = vrot.lane.b32.xlu2 %v598_v20, %s1936_s24 }
 0x33c   : > { %v601_v25 = vpop.f32.mrf.mxu1 }
 0x33d   : > { %616 = vrot.lane.b32.xlu0 %v601_v25, %s1936_s24 }
 0x344   : > { %v604_v26 = vpop.f32.mrf.mxu1 }
 0x345   : > { %618 = vrot.lane.b32.xlu1 %v604_v26, %s1936_s24 }
 0x34c   : > { %v607_v27 = vpop.f32.mrf.mxu1 }
 0x34d   : > { %620 = vrot.lane.b32.xlu2 %v607_v27, %s1936_s24 }
 0x38f   : > { %v615_v22 = vpop.permute.xlu2 %614 }
 0x390   : > { %v626_v34 = vsel %vm74_vm0, %v577_v39, %v615_v22 }
 0x391   : > { %1654 = vmatmul.msk.f32.vlgmr.msra.gmra.mxu2 %vm335_vm4, %v626_v34 }
 0x3a7   : > { %v621_v51 = vpop.permute.xlu2 %620 }
 0x3a8   : > { %v629_v47 = vsel %vm74_vm0, %v580_v32, %v621_v51  ;;  %v753_v51 = vld [vmem:[%s2995_s7 + $0x10] sm:$0xff] }
 0x3af   : > { %v617_v36 = vpop.permute.xlu0 %616 }
 0x3b0   : > { %v627_v41 = vsel %vm74_vm0, %v578_v16, %v617_v36 }
 0x3b1   : > { %1655 = vmatmul.msk.f32.gmra.mxu2 %vm335_vm4, %v627_v41 }
 0x3b7   : > { %v619_v42 = vpop.permute.xlu1 %618 }
 0x3b8   : > { %v628_v38 = vsel %vm74_vm0, %v579_v60, %v619_v42 }
 0x3b9   : > { %1656 = vmatmul.msk.f32.gmra.mxu2 %vm335_vm4, %v628_v38 }
 0x3c1   : > { %1657 = vmatmul.msk.f32.gmra.mxu2 %vm335_vm4, %v629_v47 }
 0x414   : > { %v667_v58 = vpop.f32.mrf.mxu2 }
 0x415   : > { %v679_v50 = vadd.f32 %v667_v58, %v2231_v9 }
 0x417   : > { %691 = vrot.lane.b32.xlu0 %v679_v50, %s1934_s19 }
 0x434   : > { %v670_v40 = vpop.f32.mrf.mxu2 }
 0x435   : > { %v680_v35 = vadd.f32 %v670_v40, %v2233_v11 }
 0x437   : > { %693 = vrot.lane.b32.xlu0 %v680_v35, %s1934_s19  ;;  %713 = vrot.lane.b32.xlu1 %v680_v35, %s1937_s20  ;;  %v684_v41 = vmul.f32 %v680_v35, %v2246_v43 }
 0x43c   : > { %v673_v60 = vpop.f32.mrf.mxu2 }
 0x43d   : > { %v681_v16 = vadd.f32 %v673_v60, %v313_v49 }
 0x43f   : > { %695 = vrot.lane.b32.xlu1 %v681_v16, %s1934_s19  ;;  %735 = vrot.lane.b32.xlu2 %v681_v16, %s1936_s24  ;;  %v685_v23 = vmul.f32 %v681_v16, %v2282_v61 }
 0x444   : > { %v676_v32 = vpop.f32.mrf.mxu2 }
 0x445   : > { %v682_v39 = vadd.f32 %v676_v32, %v316_v57  ;;  %v683_v32 = vmul.f32 %v679_v50, %v2264_v52 }
 0x447   : > { %715 = vrot.lane.b32.xlu1 %v681_v16, %s1937_s20  ;;  %717 = vrot.lane.b32.xlu2 %v682_v39, %s1937_s20  ;;  %v686_v22 = vmul.f32 %v682_v39, %v2314_v31 }
 0x448   : > { %697 = vrot.lane.b32.xlu0 %v682_v39, %s1934_s19 }
 0x44f   : > { %733 = vrot.lane.b32.xlu1 %v680_v35, %s1936_s24  ;;  %737 = vrot.lane.b32.xlu2 %v682_v39, %s1936_s24  ;;  %v754_v35 = vld [vmem:[%s2995_s7 + $0x18] sm:$0xff] }
 0x450   : > { %711 = vrot.lane.b32.xlu0 %v679_v50, %s1937_s20 }
 0x457   : > { %731 = vrot.lane.b32.xlu2 %v679_v50, %s1936_s24 }
 0x489   : > { %v692_v17 = vpop.permute.xlu0 %691 }
 0x48a   : > { %v703_v58 = vmul.f32 %v2269_v53, %v692_v17 }
 0x499   : > { %v736_v9 = vpop.permute.xlu2 %735 }
 0x49a   : > { %v745_v36 = vmul.f32 %v2299_v21, %v736_v9 }
 0x4a1   : > { %v718_v18 = vpop.permute.xlu2 %717 }
 0x4a2   : > { %v726_v38 = vmul.f32 %v2325_v37, %v718_v18 }
 0x4a9   : > { %v714_v11 = vpop.permute.xlu1 %713  ;;  %v694_v46 = vpop.permute.xlu0 %693 }
 0x4aa   : > { %v738_v20 = vpop.permute.xlu2 %737  ;;  %v704_v25 = vmul.f32 %v2251_v44, %v694_v46  ;;  %v724_v16 = vmul.f32 %v2256_v45, %v714_v11  ;;  %v752_v11 = vld [vmem:[%s2995_s7 + $0x8] sm:$0xff] }
 0x4ab   : > { %v746_v40 = vmul.f32 %v2335_v48, %v738_v20 }
 0x4ac   : > { %v708_v49 = vadd.f32 %v704_v25, %v684_v41 }
 0x4ae   : > { %v728_v18 = vadd.f32 %v724_v16, %v708_v49  ;;  %v770_v16 = vsub.f32 1.0, %v2368_v55 }
 0x4b1   : > { %v696_v19 = vpop.permute.xlu1 %695 }
 0x4b2   : > { %v705_v8 = vmul.f32 %v2287_v62, %v696_v19  ;;  %v732_v19 = vpop.permute.xlu2 %731 }
 0x4b3   : > { %v743_v25 = vmul.f32 %v2309_v29, %v732_v19 }
 0x4b4   : > { %v709_v26 = vadd.f32 %v705_v8, %v685_v23  ;;  %v707_v8 = vadd.f32 %v703_v58, %v683_v32 }
 0x4b9   : > { %v716_v24 = vpop.permute.xlu1 %715 }
 0x4ba   : > { %v725_v27 = vmul.f32 %v2292_v63, %v716_v24  ;;  %v698_v30 = vpop.permute.xlu0 %697 }
 0x4bb   : > { %v706_v34 = vmul.f32 %v2319_v33, %v698_v30 }
 0x4bc   : > { %v729_v42 = vadd.f32 %v725_v27, %v709_v26  ;;  %v751_v27 = vld [vmem:[%s2995_s7] sm:$0xff] }
 0x4bd   : > { %v710_v47 = vadd.f32 %v706_v34, %v686_v22 }
 0x4be   : > { %v749_v57 = vadd.f32 %v745_v36, %v729_v42 }
 0x4bf   : > { %v730_v60 = vadd.f32 %v726_v38, %v710_v47  ;;  %v768_v38 = vsub.f32 1.0, %v2381_v10  ;;  %v764_v47 = vmul.f32 %v1924_v6, %v2381_v10 }
 0x4c0   : > { %v757_v21 = vadd.f32 %v753_v51, %v749_v57  ;;  %v769_v57 = vsub.f32 1.0, %v2372_v56 }
 0x4c1   : > { %v750_v39 = vadd.f32 %v746_v40, %v730_v60  ;;  %v734_v9 = vpop.permute.xlu1 %733  ;;  %v765_v40 = vmul.f32 %v1920_v5, %v2372_v56  ;;  %v767_v56 = vsub.f32 1.0, %v2383_v28 }
 0x4c2   : > { %1809 = vtanh.f32 %v757_v21  ;;  %v744_v46 = vmul.f32 %v2345_v59, %v734_v9  ;;  %v712_v17 = vpop.permute.xlu0 %711  ;;  %v766_v21 = vmul.f32 %v1916_v4, %v2368_v55 }
 0x4c3   : > { %v758_v20 = vadd.f32 %v754_v35, %v750_v39  ;;  %v723_v23 = vmul.f32 %v2274_v54, %v712_v17  ;;  %v763_v39 = vmul.f32 %v1928_v7, %v2383_v28 }
 0x4c4   : > { %v748_v24 = vadd.f32 %v744_v46, %v728_v18 }
 0x4c5   : > { %1811 = vtanh.f32 %v758_v20  ;;  %v727_v50 = vadd.f32 %v723_v23, %v707_v8  ;;  %v948_v23 = vld [vmem:[%s2996_s8 + $0xb8] sm:$0xff] }
 0x4c6   : > { %v756_v26 = vadd.f32 %v752_v11, %v748_v24  ;;  %v945_v24 = vld [vmem:[%s2996_s8 + $0xa0] sm:$0xff] }
 0x4c7   : > { %v747_v30 = vadd.f32 %v743_v25, %v727_v50  ;;  %v940_v25 = vld [vmem:[%s2996_s8 + $0x78] sm:$0xff]  ;;  %v941_v50 = vld [vmem:[%s2996_s8 + $0x80] sm:$0xff] }
 0x4c8   : > { %v1810_v22 = vpop.eup %1809  ;;  %1813 = vtanh.f32 %v756_v26 }
 0x4c9   : > { %v755_v34 = vadd.f32 %v751_v27, %v747_v30  ;;  %779 = vrot.lane.b32.xlu1 %v1810_v22, %s1936_s24  ;;  %v942_v27 = vld [vmem:[%s2996_s8 + $0x88] sm:$0xff] }
 0x4cb   : > { %v1812_v36 = vpop.eup %1811  ;;  %1815 = vtanh.f32 %v755_v34 }
 0x4cc   : > { %781 = vrot.lane.b32.xlu0 %v1812_v36, %s1936_s24 }
 0x4ce   : > { %v1814_v41 = vpop.eup %1813 }
 0x4cf   : > { %777 = vrot.lane.b32.xlu2 %v1814_v41, %s1936_s24 }
 0x4d1   : > { %v1816_v42 = vpop.eup %1815 }
 0x4d4   : > { %775 = vrot.lane.b32.xlu0 %v1816_v42, %s1936_s24 }
 0x529   : > { %v778_v51 = vpop.permute.xlu2 %777 }
 0x52a   : > { %v788_v49 = vmul.f32 %v778_v51, %v768_v38  ;;  %v937_v38 = vld [vmem:[%s2996_s8 + $0x60] sm:$0xff]  ;;  %v938_v51 = vld [vmem:[%s2996_s8 + $0x68] sm:$0xff] }
 0x52c   : > { %v2482_v6 = vadd.f32 %v788_v49, %v764_v47   ;;  %v939_v47 = vld [vmem:[%s2996_s8 + $0x70] sm:$0xff]  ;;  %v934_v49 = vld [vmem:[%s2996_s8 + $0x48] sm:$0xff] }
 0x52e   : > { %801 = vrot.lane.b32.xlu0 %v2482_v6, %s1934_s19  ;;  %v1861_v6 = vld [vmem:[%s3002_s14] ss:$0 sm:$0xff] (%p52_p0) }
 0x536   : > { %868 = vrot.lane.b32.xlu0 %v1904_v1, %s1934_s19 }
 0x53b   : > { %v780_v58 = vpop.permute.xlu1 %779 }
 0x53c   : > { %v789_v60 = vmul.f32 %v780_v58, %v769_v57  ;;  %v935_v57 = vld [vmem:[%s2996_s8 + $0x50] sm:$0xff]  ;;  %v936_v58 = vld [vmem:[%s2996_s8 + $0x58] sm:$0xff] }
 0x53e   : > { %v2492_v5 = vadd.f32 %v789_v60, %v765_v40   ;;  %v782_v10 = vpop.permute.xlu0 %781  ;;  %v931_v40 = vld [vmem:[%s2996_s8 + $0x30] sm:$0xff]  ;;  %v932_v60 = vld [vmem:[%s2996_s8 + $0x38] sm:$0xff] }
 0x53f   : > { %v790_v35 = vmul.f32 %v782_v10, %v770_v16  ;;  %v933_v16 = vld [vmem:[%s2996_s8 + $0x40] sm:$0xff]  ;;  %v928_v10 = vld [vmem:[%s2996_s8 + $0x18] sm:$0xff] }
 0x540   : > { %803 = vrot.lane.b32.xlu2 %v2492_v5, %s1934_s19 }
 0x541   : > { %v2498_v4 = vadd.f32 %v790_v35, %v766_v21   ;;  %v929_v21 = vld [vmem:[%s2996_s8 + $0x20] sm:$0xff]  ;;  %v930_v35 = vld [vmem:[%s2996_s8 + $0x28] sm:$0xff] }
 0x543   : > { %805 = vrot.lane.b32.xlu1 %v2498_v4, %s1934_s19 }
 0x546   : > { %v776_v32 = vpop.permute.xlu0 %775 }
 0x547   : > { %v787_v9 = vmul.f32 %v776_v32, %v767_v56  ;;  %v925_v56 = vld [vmem:[%s2996_s8] sm:$0xff]  ;;  %v926_v32 = vld [vmem:[%s2996_s8 + $0x8] sm:$0xff] }
 0x548   : > { %870 = vrot.lane.b32.xlu2 %v1900_v0, %s1934_s19 }
 0x549   : > { %v2507_v7 = vadd.f32 %v787_v9, %v763_v39   ;;  %v927_v39 = vld [vmem:[%s2996_s8 + $0x10] sm:$0xff] }
 0x54a   : > { %v1062_v9 = vld [vmem:[%s2997_s9 + $0x70] sm:$0xff] }
 0x54b   : > { %799 = vrot.lane.b32.xlu1 %v2507_v7, %s1934_s19  ;;  %v1505_v7 = vld [vmem:[%s3001_s13 + $0x8] sm:$0xff] (%p52_p0) }
 0x550   : > { %864 = vrot.lane.b32.xlu2 %v1912_v3, %s1934_s19 }
 0x553   : > { %866 = vrot.lane.b32.xlu1 %v1908_v2, %s1934_s19 }
 0x59a   : > { %v2515_v55 = vpop.permute.xlu2 %803 }
 0x5a0   : > { %v2517_v18 = vpop.permute.xlu0 %801 }
 0x5a2   : > { %v2519_v28 = vpop.permute.xlu2 %870 }
 0x5a3   : > { %888 = vmatpush.msrb.mxu0 %v2519_v28 }
 0x5a8   : > { %v2522_v19 = vpop.permute.xlu0 %868 }
 0x5a9   : > { %889 = vmatpush.msrb.mxu0 %v2522_v19 }
 0x5aa   : > { %v2537_v20 = vpop.permute.xlu2 %864 }
 0x5b5   : > { %v2525_v46 = vpop.permute.xlu1 %805 }
 0x5b6   : > { %823 = vmatpush.msra.mxu3 %v2525_v46 }
 0x5b8   : > { %824 = vmatpush.msra.mxu3 %v2515_v55 }
 0x5ba   : > { %825 = vmatpush.msra.mxu3 %v2517_v18 }
 0x5bd   : > { %v2530_v17 = vpop.permute.xlu1 %799 }
 0x5be   : > { %826 = vmatpush.msra.mxu3 %v2530_v17 }
 0x5bf   : > { %1658 = vmatmul.msk.f32.vlgmr.msra.gmra.mxu3 %vm74_vm0, %v2084_v12 }
 0x5c0   : > { %1027 = vmatpush.msrb.mxu3 %v948_v23  ;;  %v1054_v23 = vld [vmem:[%s2997_s9 + $0x30] sm:$0xff] }
 0x5c2   : > { %1028 = vmatpush.msrb.mxu3 %v945_v24  ;;  %v1048_v24 = vld [vmem:[%s2997_s9] sm:$0xff] }
 0x5c4   : > { %1029 = vmatpush.msrb.mxu3 %v942_v27  ;;  %v1057_v27 = vld [vmem:[%s2997_s9 + $0x48] sm:$0xff] }
 0x5c5   : > { %v2535_v8 = vpop.permute.xlu1 %866 }
 0x5c6   : > { %890 = vmatpush.msrb.mxu0 %v2535_v8  ;;  %1030 = vmatpush.msrb.mxu3 %v939_v47 }
 0x5c7   : > { %1659 = vmatmul.msk.f32.gmra.mxu3 %vm74_vm0, %v2095_v13 }
 0x5c8   : > { %891 = vmatpush.msrb.mxu0 %v2537_v20  ;;  %1031 = vmatpush.msrb.mxu3 %v936_v58 }
 0x5c9   : > { %1662 = vmatmul.msk.f32.vlgmr.msrb.gmra.mxu0 %vm74_vm0, %v2084_v12  ;;  %v946_v12 = vld [vmem:[%s2996_s8 + $0xa8] sm:$0xff] }
 0x5ca   : > { %969 = vmatpush.msrb.mxu1 %v946_v12  ;;  %1032 = vmatpush.msrb.mxu3 %v933_v16  ;;  %v1058_v12 = vld [vmem:[%s2997_s9 + $0x50] sm:$0xff] }
 0x5cb   : > { %1084 = vmatpush.msra.mxu0 %v1062_v9 }
 0x5cc   : > { %1033 = vmatpush.msrb.mxu3 %v930_v35 }
 0x5ce   : > { %1034 = vmatpush.msrb.mxu3 %v927_v39 }
 0x5cf   : > { %1660 = vmatmul.msk.f32.gmra.mxu3 %vm74_vm0, %v2102_v14 }
 0x5d1   : > { %1663 = vmatmul.msk.f32.gmra.mxu0 %vm74_vm0, %v2095_v13  ;;  %v947_v13 = vld [vmem:[%s2996_s8 + $0xb0] sm:$0xff] }
 0x5d2   : > { %998 = vmatpush.msrb.mxu2 %v947_v13  ;;  %v1056_v13 = vld [vmem:[%s2997_s9 + $0x40] sm:$0xff] }
 0x5d7   : > { %1661 = vmatmul.msk.f32.gmra.mxu3 %vm74_vm0, %v2109_v15 }
 0x5d9   : > { %1664 = vmatmul.msk.f32.gmra.mxu0 %vm74_vm0, %v2102_v14  ;;  %v943_v14 = vld [vmem:[%s2996_s8 + $0x90] sm:$0xff] }
 0x5da   : > { %970 = vmatpush.msrb.mxu1 %v943_v14  ;;  %v1052_v14 = vld [vmem:[%s2997_s9 + $0x20] sm:$0xff] }
 0x5dc   : > { %971 = vmatpush.msrb.mxu1 %v940_v25  ;;  %v1063_v25 = vld [vmem:[%s2997_s9 + $0x78] sm:$0xff] }
 0x5de   : > { %972 = vmatpush.msrb.mxu1 %v937_v38 }
 0x5e0   : > { %973 = vmatpush.msrb.mxu1 %v934_v49 }
 0x5e1   : > { %1665 = vmatmul.msk.f32.gmra.mxu0 %vm74_vm0, %v2109_v15  ;;  %v944_v15 = vld [vmem:[%s2996_s8 + $0x98] sm:$0xff] }
 0x5e2   : > { %999 = vmatpush.msrb.mxu2 %v944_v15  ;;  %974 = vmatpush.msrb.mxu1 %v931_v40  ;;  %v1050_v15 = vld [vmem:[%s2997_s9 + $0x10] sm:$0xff] }
 0x5e4   : > { %1000 = vmatpush.msrb.mxu2 %v941_v50  ;;  %975 = vmatpush.msrb.mxu1 %v928_v10  ;;  %v1061_v50 = vld [vmem:[%s2997_s9 + $0x68] sm:$0xff] }
 0x5e6   : > { %1001 = vmatpush.msrb.mxu2 %v938_v51  ;;  %976 = vmatpush.msrb.mxu1 %v925_v56 }
 0x5e8   : > { %1002 = vmatpush.msrb.mxu2 %v935_v57  ;;  %1113 = vmatpush.msra.mxu1 %v1063_v25 }
 0x5ea   : > { %1003 = vmatpush.msrb.mxu2 %v932_v60  ;;  %1114 = vmatpush.msra.mxu1 %v1061_v50 }
 0x5ec   : > { %1004 = vmatpush.msrb.mxu2 %v929_v21 }
 0x5ee   : > { %1005 = vmatpush.msrb.mxu2 %v926_v32 }
 0x642   : > { %v828_v11 = vpop.f32.mrf.mxu3 }
 0x643   : > { %844 = vrot.lane.b32.xlu0 %v828_v11, %s1936_s24  ;;  %v1060_v11 = vld [vmem:[%s2997_s9 + $0x60] sm:$0xff] }
 0x644   : > { %1085 = vmatpush.msra.mxu0 %v1060_v11 }
 0x646   : > { %v893_v26 = vpop.f32.mrf.mxu0  ;;  %1086 = vmatpush.msra.mxu0 %v1058_v12 }
 0x648   : > { %1087 = vmatpush.msra.mxu0 %v1056_v13 }
 0x64a   : > { %v831_v30 = vpop.f32.mrf.mxu3  ;;  %1088 = vmatpush.msra.mxu0 %v1054_v23 }
 0x64b   : > { %846 = vrot.lane.b32.xlu1 %v831_v30, %s1936_s24  ;;  %v1055_v30 = vld [vmem:[%s2997_s9 + $0x38] sm:$0xff] }
 0x64c   : > { %1089 = vmatpush.msra.mxu0 %v1052_v14 }
 0x64e   : > { %v896_v22 = vpop.f32.mrf.mxu0  ;;  %1090 = vmatpush.msra.mxu0 %v1050_v15 }
 0x650   : > { %1091 = vmatpush.msra.mxu0 %v1048_v24 }
 0x652   : > { %v834_v34 = vpop.f32.mrf.mxu3 }
 0x653   : > { %848 = vrot.lane.b32.xlu2 %v834_v34, %s1936_s24  ;;  %909 = vrot.lane.b32.xlu1 %v893_v26, %s1936_s24  ;;  %v1059_v26 = vld [vmem:[%s2997_s9 + $0x58] sm:$0xff] }
 0x654   : > { %1115 = vmatpush.msra.mxu1 %v1059_v26  ;;  %v1051_v34 = vld [vmem:[%s2997_s9 + $0x18] sm:$0xff] }
 0x656   : > { %v899_v36 = vpop.f32.mrf.mxu0  ;;  %1116 = vmatpush.msra.mxu1 %v1057_v27 }
 0x658   : > { %1117 = vmatpush.msra.mxu1 %v1055_v30 }
 0x65a   : > { %v837_v41 = vpop.f32.mrf.mxu3 }
 0x65b   : > { %850 = vrot.lane.b32.xlu0 %v837_v41, %s1936_s24  ;;  %911 = vrot.lane.b32.xlu2 %v896_v22, %s1936_s24  ;;  %v1053_v22 = vld [vmem:[%s2997_s9 + $0x28] sm:$0xff] }
 0x65c   : > { %1118 = vmatpush.msra.mxu1 %v1053_v22  ;;  %v1049_v41 = vld [vmem:[%s2997_s9 + $0x8] sm:$0xff] }
 0x65e   : > { %v902_v42 = vpop.f32.mrf.mxu0  ;;  %1119 = vmatpush.msra.mxu1 %v1051_v34 }
 0x65f   : > { %915 = vrot.lane.b32.xlu1 %v902_v42, %s1936_s24 }
 0x660   : > { %1120 = vmatpush.msra.mxu1 %v1049_v41 }
 0x663   : > { %913 = vrot.lane.b32.xlu0 %v899_v36, %s1936_s24 }
 0x6ad   : > { %v849_v47 = vpop.permute.xlu2 %848 }
 0x6ae   : > { %v858_v57 = vsel %vm74_vm0, %v2515_v55, %v849_v47 }
 0x6b5   : > { %v845_v36 = vpop.permute.xlu0 %844 }
 0x6b6   : > { %v856_v42 = vsel %vm74_vm0, %v2530_v17, %v845_v36 }
 0x6b7   : > { %1666 = vmatmul.msk.f32.vlgmr.msrb.gmra.mxu1 %vm335_vm4, %v856_v42  ;;  %1670 = vmatmul.msk.f32.vlgmr.msrb.gmra.mxu2 %vm335_vm4, %v856_v42 }
 0x6b8   : > { %1674 = vmatmul.msk.f32.vlgmr.msrb.gmra.mxu3 %vm335_vm4, %v856_v42 }
 0x6bd   : > { %v847_v38 = vpop.permute.xlu1 %846 }
 0x6be   : > { %v857_v51 = vsel %vm74_vm0, %v2517_v18, %v847_v38  ;;  %v912_v18 = vpop.permute.xlu2 %911 }
 0x6bf   : > { %1667 = vmatmul.msk.f32.gmra.mxu1 %vm335_vm4, %v857_v51  ;;  %1671 = vmatmul.msk.f32.gmra.mxu2 %vm335_vm4, %v857_v51  ;;  %v922_v55 = vsel %vm74_vm0, %v2535_v8, %v912_v18 }
 0x6c0   : > { %1675 = vmatmul.msk.f32.gmra.mxu3 %vm335_vm4, %v857_v51 }
 0x6c5   : > { %v910_v49 = vpop.permute.xlu1 %909 }
 0x6c6   : > { %v921_v17 = vsel %vm74_vm0, %v2537_v20, %v910_v49 }
 0x6c7   : > { %1668 = vmatmul.msk.f32.gmra.mxu1 %vm335_vm4, %v858_v57  ;;  %1672 = vmatmul.msk.f32.gmra.mxu2 %vm335_vm4, %v858_v57 }
 0x6c8   : > { %1676 = vmatmul.msk.f32.gmra.mxu3 %vm335_vm4, %v858_v57  ;;  %1678 = vmatmul.msk.f32.vlgmr.msra.gmra.mxu0 %vm335_vm4, %v921_v17 }
 0x6cd   : > { %v851_v58 = vpop.permute.xlu0 %850 }
 0x6ce   : > { %v859_v40 = vsel %vm74_vm0, %v2525_v46, %v851_v58 }
 0x6cf   : > { %1669 = vmatmul.msk.f32.gmra.mxu1 %vm335_vm4, %v859_v40  ;;  %1673 = vmatmul.msk.f32.gmra.mxu2 %vm335_vm4, %v859_v40 }
 0x6d0   : > { %1677 = vmatmul.msk.f32.gmra.mxu3 %vm335_vm4, %v859_v40  ;;  %1679 = vmatmul.msk.f32.gmra.mxu0 %vm335_vm4, %v922_v55 }
 0x6d1   : > { %v916_v46 = vpop.permute.xlu1 %915 }
 0x6d2   : > { %v924_v10 = vsel %vm74_vm0, %v2519_v28, %v916_v46 }
 0x6d5   : > { %v914_v60 = vpop.permute.xlu0 %913 }
 0x6d6   : > { %v923_v16 = vsel %vm74_vm0, %v2522_v19, %v914_v60 }
 0x6d7   : > { %1682 = vmatmul.msk.f32.vlgmr.msra.gmra.mxu1 %vm335_vm4, %v921_v17 }
 0x6d8   : > { %1680 = vmatmul.msk.f32.gmra.mxu0 %vm335_vm4, %v923_v16 }
 0x6df   : > { %1683 = vmatmul.msk.f32.gmra.mxu1 %vm335_vm4, %v922_v55 }
 0x6e0   : > { %1681 = vmatmul.msk.f32.gmra.mxu0 %vm335_vm4, %v924_v10 }
 0x6e7   : > { %1684 = vmatmul.msk.f32.gmra.mxu1 %vm335_vm4, %v923_v16 }
 0x6ef   : > { %1685 = vmatmul.msk.f32.gmra.mxu1 %vm335_vm4, %v924_v10 }
 0x734   : > { %v978_v21 = vpop.f32.mrf.mxu1 }
 0x73a   : > { %v1007_v12 = vpop.f32.mrf.mxu2 }
 0x73c   : > { %v981_v35 = vpop.f32.mrf.mxu1 }
 0x742   : > { %v1010_v24 = vpop.f32.mrf.mxu2 }
 0x744   : > { %v984_v56 = vpop.f32.mrf.mxu1 }
 0x745   : > { %v1093_v32 = vpop.f32.mrf.mxu0 }
 0x746   : > { %v1134_v39 = vadd.f32 %v1093_v32, %v978_v21 }
 0x748   : > { %1150 = vrot.lane.b32.xlu0 %v1134_v39, %s1937_s20  ;;  %v1142_v49 = vmul.f32 %v1134_v39, %v2264_v52  ;;  %v1205_v39 = vld [vmem:[%s2999_s11 + $0x18] sm:$0xff] }
 0x74a   : > { %v1013_v30 = vpop.f32.mrf.mxu2 }
 0x74c   : > { %v987_v9 = vpop.f32.mrf.mxu1 }
 0x74d   : > { %v1096_v11 = vpop.f32.mrf.mxu0 }
 0x74e   : > { %v1136_v13 = vadd.f32 %v1096_v11, %v981_v35 }
 0x750   : > { %1152 = vrot.lane.b32.xlu1 %v1136_v13, %s1937_s20  ;;  %v1143_v21 = vmul.f32 %v1136_v13, %v2246_v43 }
 0x752   : > { %v1016_v36 = vpop.f32.mrf.mxu2 }
 0x754   : > { %v1122_v23 = vpop.f32.mrf.mxu1 }
 0x755   : > { %v1099_v14 = vpop.f32.mrf.mxu0  ;;  %v1135_v26 = vadd.f32 %v1122_v23, %v1007_v12 }
 0x756   : > { %v1138_v15 = vadd.f32 %v1099_v14, %v984_v56  ;;  %v1202_v14 = vld [vmem:[%s2999_s11] sm:$0xff] }
 0x757   : > { %v1170_v58 = vmul.f32 %v2274_v54, %v1135_v26 }
 0x758   : > { %1154 = vrot.lane.b32.xlu0 %v1138_v15, %s1937_s20  ;;  %v1144_v54 = vmul.f32 %v1138_v15, %v2282_v61 }
 0x75c   : > { %v1125_v25 = vpop.f32.mrf.mxu1 }
 0x75d   : > { %v1102_v50 = vpop.f32.mrf.mxu0  ;;  %v1137_v38 = vadd.f32 %v1125_v25, %v1010_v24 }
 0x75e   : > { %v1140_v27 = vadd.f32 %v1102_v50, %v987_v9 }
 0x75f   : > { %v1171_v52 = vmul.f32 %v2256_v45, %v1137_v38 }
 0x760   : > { %1182 = vrot.lane.b32.xlu0 %v1135_v26, %s1937_s20  ;;  %1156 = vrot.lane.b32.xlu2 %v1140_v27, %s1937_s20  ;;  %v1145_v17 = vmul.f32 %v1140_v27, %v2314_v31 }
 0x764   : > { %v1128_v22 = vpop.f32.mrf.mxu1 }
 0x765   : > { %v1139_v34 = vadd.f32 %v1128_v22, %v1013_v30 }
 0x767   : > { %1186 = vrot.lane.b32.xlu1 %v1139_v34, %s1937_s20  ;;  %v1172_v43 = vmul.f32 %v2292_v63, %v1139_v34  ;;  %v1204_v34 = vld [vmem:[%s2999_s11 + $0x10] sm:$0xff] }
 0x76c   : > { %v1131_v41 = vpop.f32.mrf.mxu1 }
 0x76d   : > { %v1141_v42 = vadd.f32 %v1131_v41, %v1016_v36 }
 0x76f   : > { %1188 = vrot.lane.b32.xlu2 %v1141_v42, %s1937_s20  ;;  %v1173_v40 = vmul.f32 %v2325_v37, %v1141_v42 }
 0x777   : > { %1184 = vrot.lane.b32.xlu2 %v1137_v38, %s1937_s20 }
 0x7ba   : > { %v1151_v51 = vpop.permute.xlu0 %1150  ;;  %v1157_v47 = vpop.permute.xlu2 %1156 }
 0x7bb   : > { %v1162_v57 = vmul.f32 %v2269_v53, %v1151_v51  ;;  %v1165_v18 = vmul.f32 %v2319_v33, %v1157_v47 }
 0x7bd   : > { %v1166_v55 = vadd.f32 %v1162_v57, %v1142_v49  ;;  %v1169_v60 = vadd.f32 %v1165_v18, %v1145_v17 }
 0x7bf   : > { %v1177_v16 = vadd.f32 %v1173_v40, %v1169_v60  ;;  %v1174_v46 = vadd.f32 %v1170_v58, %v1166_v55 }
 0x7c2   : > { %v1153_v10 = vpop.permute.xlu1 %1152 }
 0x7c3   : > { %v1163_v35 = vmul.f32 %v2251_v44, %v1153_v10 }
 0x7c5   : > { %v1167_v31 = vadd.f32 %v1163_v35, %v1143_v21 }
 0x7c7   : > { %v1175_v56 = vadd.f32 %v1171_v52, %v1167_v31 }
 0x7c9   : > { %v1189_v53 = vpop.permute.xlu2 %1188 }
 0x7ca   : > { %v1155_v32 = vpop.permute.xlu0 %1154  ;;  %v1197_v33 = vmul.f32 %v2335_v48, %v1189_v53 }
 0x7cb   : > { %v1164_v37 = vmul.f32 %v2287_v62, %v1155_v32  ;;  %v1203_v62 = vld [vmem:[%s2999_s11 + $0x8] sm:$0xff] }
 0x7cc   : > { %v1201_v9 = vadd.f32 %v1197_v33, %v1177_v16 }
 0x7cd   : > { %v1168_v44 = vadd.f32 %v1164_v37, %v1144_v54 }
 0x7ce   : > { %v1209_v11 = vadd.f32 %v1205_v39, %v1201_v9 }
 0x7cf   : > { %v1176_v45 = vadd.f32 %v1172_v43, %v1168_v44 }
 0x7d0   : > { %v1689_v12 = vmul.f32 -1.442695, %v1209_v11 }
 0x7d1   : > { %v1185_v13 = vpop.permute.xlu2 %1184 }
 0x7d2   : > { %1817 = vpow2.f32 %v1689_v12  ;;  %v1183_v23 = vpop.permute.xlu0 %1182  ;;  %v1195_v48 = vmul.f32 %v2345_v59, %v1185_v13 }
 0x7d3   : > { %v1194_v61 = vmul.f32 %v2309_v29, %v1183_v23  ;;  %v2754_v29 = vld [vmem:[%s2990_s2 + $0x70] sm:$0xff] }
 0x7d4   : > { %v1199_v63 = vadd.f32 %v1195_v48, %v1175_v56 }
 0x7d5   : > { %v1198_v15 = vadd.f32 %v1194_v61, %v1174_v46  ;;  %v1846_v61 = vld [vmem:[%s2990_s2 + $0x20] sm:$0xff] }
 0x7d6   : > { %v1207_v24 = vadd.f32 %v1203_v62, %v1199_v63 }
 0x7d7   : > { %v1206_v25 = vadd.f32 %v1202_v14, %v1198_v15 }
 0x7d8   : > { %v1818_v50 = vpop.eup %1817  ;;  %v1687_v26 = vmul.f32 -1.442695, %v1207_v24 }
 0x7d9   : > { %v1225_v27 = vadd.f32 1.0, %v1818_v50  ;;  %v1686_v30 = vmul.f32 -1.442695, %v1206_v25  ;;  %v1187_v22 = vpop.permute.xlu1 %1186 }
 0x7da   : > { %1819 = vpow2.f32 %v1687_v26  ;;  %v1196_v59 = vmul.f32 %v2754_v29, %v1187_v22 }
 0x7db   : > { %1821 = vrcp.f32 %v1225_v27  ;;  %v1282_v58 = vand.u32 2147483648, %v1225_v27  ;;  %v1280_v55 = vand.u32 2147483647, %v1225_v27  ;;  %vm1276_vm9 = vweird.f32 %v1225_v27 }
 0x7dc   : > { %1823 = vpow2.f32 %v1686_v30  ;;  %v1200_v36 = vadd.f32 %v1196_v59, %v1176_v45 }
 0x7dd   : > { %v1283_v21 = vor.u32 1.1754944e-38, %v1282_v58  ;;  %vm1281_vm11 = vcmp.eq.f32.partialorder %v1280_v55, 8.507059e+37  ;;  %v1343_v58 = vld [vmem:[%s2998_s10 + $0x20] sm:$0xff]  ;;  %v1341_v55 = vld [vmem:[%s2998_s10 + $0x10] sm:$0xff] }
 0x7de   : > { %v1208_v41 = vadd.f32 %v1204_v34, %v1200_v36 }
 0x7e0   : > { %v1820_v42 = vpop.eup %1819  ;;  %v1688_v38 = vmul.f32 -1.442695, %v1208_v41 }
 0x7e1   : > { %v1822_v51 = vpop.eup %1821  ;;  %v1223_v47 = vadd.f32 1.0, %v1820_v42  ;;  %v1842_v42 = vld [vmem:[%s2989_s1] sm:$0xff] }
 0x7e2   : > { %v1824_v49 = vpop.eup %1823  ;;  %v1272_v17 = vmul.f32 %v1822_v51, %v1225_v27  ;;  %1825 = vpow2.f32 %v1688_v38  ;;  %vm1277_vm8 = vweird.f32 %v1822_v51 }
 0x7e3   : > { %v1222_v57 = vadd.f32 1.0, %v1824_v49  ;;  %1827 = vrcp.f32 %v1223_v47  ;;  %vm1278_vm10 = vmor %vm1276_vm9, %vm1277_vm8  ;;  %vm1246_vm12 = vweird.f32 %v1223_v47  ;;  %v1250_v12 = vand.u32 2147483647, %v1223_v47 }
 0x7e4   : > { %v1273_v18 = vsub.f32 1.0, %v1272_v17  ;;  %v1252_v13 = vand.u32 2147483648, %v1223_v47  ;;  %v1346_v17 = vld [vmem:[%s2998_s10 + $0x38] sm:$0xff] }
 0x7e5   : > { %1829 = vrcp.f32 %v1222_v57  ;;  %vm1231_vm2 = vweird.f32 %v1222_v57  ;;  %v1237_v62 = vand.u32 2147483648, %v1222_v57  ;;  %v1235_v15 = vand.u32 2147483647, %v1222_v57  ;;  %1367 = vmatpush.msra.mxu3 %v1346_v17 }
 0x7e6   : > { %v1274_v40 = vmul.f32 %v1822_v51, %v1273_v18  ;;  %v1253_v25 = vor.u32 1.1754944e-38, %v1252_v13  ;;  %vm1251_vm9 = vcmp.eq.f32.partialorder %v1250_v12, 8.507059e+37  ;;  %v1344_v18 = vld [vmem:[%s2998_s10 + $0x28] sm:$0xff] }
 0x7e7   : > { %v1238_v22 = vor.u32 1.1754944e-38, %v1237_v62 }
 0x7e8   : > { %v1826_v60 = vpop.eup %1825  ;;  %v1275_v16 = vadd.f32 %v1822_v51, %v1274_v40  ;;  %v1342_v40 = vld [vmem:[%s2998_s10 + $0x18] sm:$0xff] }
 0x7e9   : > { %v1828_v46 = vpop.eup %1827  ;;  %v1224_v10 = vadd.f32 1.0, %v1826_v60  ;;  %v1340_v60 = vld [vmem:[%s2998_s10 + $0x8] sm:$0xff] }
 0x7ea   : > { %v1279_v35 = vsel %vm1278_vm10, %v1822_v51, %v1275_v16  ;;  %v1242_v52 = vmul.f32 %v1828_v46, %v1223_v47  ;;  %vm1247_vm13 = vweird.f32 %v1828_v46  ;;  %vm1236_vm10 = vcmp.eq.f32.partialorder %v1235_v15, 8.507059e+37  ;;  %v1339_v16 = vld [vmem:[%s2998_s10] sm:$0xff] }
 0x7eb   : > { %v1830_v31 = vpop.eup %1829  ;;  %1831 = vrcp.f32 %v1224_v10  ;;  %v2760_v56 = vsel %vm1281_vm11, %v1283_v21, %v1279_v35  ;;  %v1267_v45 = vand.u32 2147483648, %v1224_v10  ;;  %vm2767_vm1 = vmor %vm1246_vm12, %vm1247_vm13  ;;  %vm1261_vm5 = vweird.f32 %v1224_v10 }
 0x7ec   : > { %v2764_v53 = vmul.f32 %v2760_v56, %v2519_v28  ;;  %v1243_v32 = vsub.f32 1.0, %v1242_v52  ;;  %v1227_v33 = vmul.f32 %v1830_v31, %v1222_v57  ;;  %vm1232_vm14 = vweird.f32 %v1830_v31  ;;  %v1345_v57 = vld [vmem:[%s2998_s10 + $0x30] sm:$0xff] }
 0x7ed   : > { %v1265_v28 = vand.u32 2147483647, %v1224_v10  ;;  %vm1233_vm6 = vmor %vm1231_vm2, %vm1232_vm14  ;;  %v1268_v24 = vor.u32 1.1754944e-38, %v1267_v45  ;;  %1368 = vmatpush.msra.mxu3 %v1345_v57 }
 0x7ee   : > { %1302 = vmatpush.msra.mxu2 %v2764_v53  ;;  %v1228_v54 = vsub.f32 1.0, %v1227_v33  ;;  %v1244_v37 = vmul.f32 %v1828_v46, %v1243_v32 }
 0x7ef   : > { %vm1266_vm8 = vcmp.eq.f32.partialorder %v1265_v28, 8.507059e+37  ;;  %1369 = vmatpush.msra.mxu3 %v1344_v18 }
 0x7f0   : > { %v1229_v43 = vmul.f32 %v1830_v31, %v1228_v54  ;;  %v1245_v11 = vadd.f32 %v1828_v46, %v1244_v37  ;;  %v1036_v54 = vpop.f32.mrf.mxu3 }
 0x7f1   : > { %v1832_v39 = vpop.eup %1831  ;;  %1370 = vmatpush.msra.mxu3 %v1343_v58  ;;  %v1852_v58 = vld [vmem:[%s2990_s2 + $0x48] sm:$0xff] }
 0x7f2   : > { %v1257_v9 = vmul.f32 %v1832_v39, %v1224_v10  ;;  %vm1262_vm15 = vweird.f32 %v1832_v39  ;;  %v1230_v48 = vadd.f32 %v1830_v31, %v1229_v43  ;;  %v1249_v63 = vsel %vm2767_vm1, %v1828_v46, %v1245_v11 }
 0x7f3   : > { %vm1263_vm7 = vmor %vm1261_vm5, %vm1262_vm15  ;;  %v2775_v30 = vsel %vm1251_vm9, %v1253_v25, %v1249_v63  ;;  %1371 = vmatpush.msra.mxu3 %v1342_v40 }
 0x7f4   : > { %v1258_v44 = vsub.f32 1.0, %v1257_v9  ;;  %v1234_v26 = vsel %vm1233_vm6, %v1830_v31, %v1230_v48  ;;  %v1287_v36 = vmul.f32 %v2775_v30, %v2535_v8  ;;  %v1844_v8 = vld [vmem:[%s2989_s1 + $0x10] sm:$0xff] }
 0x7f5   : > { %v2779_v34 = vsel %vm1236_vm10, %v1238_v22, %v1234_v26  ;;  %1372 = vmatpush.msra.mxu3 %v1341_v55  ;;  %v1853_v55 = vld [vmem:[%s2990_s2 + $0x68] sm:$0xff] }
 0x7f6   : > { %v1259_v23 = vmul.f32 %v1832_v39, %v1258_v44  ;;  %v1286_v41 = vmul.f32 %v2779_v34, %v2537_v20  ;;  %v1845_v20 = vld [vmem:[%s2989_s1 + $0x18] sm:$0xff] }
 0x7f7   : > { %1373 = vmatpush.msra.mxu3 %v1340_v60 }
 0x7f8   : > { %v1260_v14 = vadd.f32 %v1832_v39, %v1259_v23  ;;  %v1039_v37 = vpop.f32.mrf.mxu3 }
 0x7f9   : > { %1374 = vmatpush.msra.mxu3 %v1339_v16 }
 0x7fa   : > { %v1264_v50 = vsel %vm1263_vm7, %v1832_v39, %v1260_v14  ;;  %v1847_v14 = vld [vmem:[%s2990_s2] sm:$0xff] }
 0x7fb   : > { %v2773_v27 = vsel %vm1266_vm8, %v1268_v24, %v1264_v50  ;;  %v1848_v50 = vld [vmem:[%s2990_s2 + $0x40] sm:$0xff] }
 0x7fc   : > { %v1288_v59 = vmul.f32 %v2773_v27, %v2522_v19  ;;  %v1843_v19 = vld [vmem:[%s2989_s1 + $0x8] sm:$0xff] }
 0x7fe   : > { %1303 = vmatpush.msra.mxu2 %v1288_v59 }
 0x800   : > { %1304 = vmatpush.msra.mxu2 %v1287_v36  ;;  %v1042_v39 = vpop.f32.mrf.mxu3 }
 0x802   : > { %1305 = vmatpush.msra.mxu2 %v1286_v41 }
 0x803   : > { %1690 = vmatmul.msk.f32.vlgmr.msra.gmra.mxu2 %vm74_vm0, %v1842_v42  ;;  %v1460_v42 = vld [vmem:[%s3000_s12] sm:$0xff] }
 0x808   : > { %v1045_v9 = vpop.f32.mrf.mxu3 }
 0x80b   : > { %1691 = vmatmul.msk.f32.gmra.mxu2 %vm74_vm0, %v1843_v19 }
 0x813   : > { %1692 = vmatmul.msk.f32.gmra.mxu2 %vm74_vm0, %v1844_v8 }
 0x81b   : > { %1693 = vmatmul.msk.f32.gmra.mxu2 %vm74_vm0, %v1845_v20 }
 0x886   : > { %v1307_v38 = vpop.f32.mrf.mxu2 }
 0x887   : > { %1323 = vrot.lane.b32.xlu1 %v1307_v38, %s1936_s24  ;;  %v1850_v38 = vld [vmem:[%s2990_s2 + $0x8] sm:$0xff] }
 0x88e   : > { %v1310_v51 = vpop.f32.mrf.mxu2 }
 0x88f   : > { %1325 = vrot.lane.b32.xlu2 %v1310_v51, %s1936_s24 }
 0x896   : > { %v1313_v47 = vpop.f32.mrf.mxu2 }
 0x897   : > { %1327 = vrot.lane.b32.xlu0 %v1313_v47, %s1936_s24  ;;  %v1851_v47 = vld [vmem:[%s2990_s2 + $0x28] sm:$0xff] }
 0x89e   : > { %v1316_v49 = vpop.f32.mrf.mxu2 }
 0x89f   : > { %1329 = vrot.lane.b32.xlu1 %v1316_v49, %s1936_s24 }
 0x8e9   : > { %v1326_v21 = vpop.permute.xlu2 %1325 }
 0x8ea   : > { %v1336_v35 = vsel %vm74_vm0, %v1287_v36, %v1326_v21  ;;  %v1849_v36 = vld [vmem:[%s2990_s2 + $0x60] sm:$0xff] }
 0x8f9   : > { %v1324_v46 = vpop.permute.xlu1 %1323 }
 0x8fa   : > { %v1335_v10 = vsel %vm74_vm0, %v1286_v41, %v1324_v46  ;;  %v1461_v46 = vld [vmem:[%s3000_s12 + $0x8] sm:$0xff] }
 0x8fb   : > { %1694 = vmatmul.msk.f32.vlgmr.msra.gmra.mxu3 %vm335_vm4, %v1335_v10 }
 0x903   : > { %1695 = vmatmul.msk.f32.gmra.mxu3 %vm335_vm4, %v1336_v35 }
 0x909   : > { %v1328_v52 = vpop.permute.xlu0 %1327 }
 0x90a   : > { %v1337_v31 = vsel %vm74_vm0, %v1288_v59, %v1328_v52 }
 0x90b   : > { %1696 = vmatmul.msk.f32.gmra.mxu3 %vm335_vm4, %v1337_v31  ;;  %v1854_v31 = vld [vmem:[%s2990_s2 + $0x38] sm:$0xff] }
 0x911   : > { %v1330_v32 = vpop.permute.xlu1 %1329 }
 0x912   : > { %v1338_v33 = vsel %vm74_vm0, %v2764_v53, %v1330_v32 }
 0x913   : > { %1697 = vmatmul.msk.f32.gmra.mxu3 %vm335_vm4, %v1338_v33  ;;  %v1855_v33 = vld [vmem:[%s2990_s2 + $0x18] sm:$0xff] }
 0x97e   : > { %v1376_v43 = vpop.f32.mrf.mxu3 }
 0x97f   : > { %v1388_v44 = vadd.f32 %v1376_v43, %v1036_v54  ;;  %v1856_v43 = vld [vmem:[%s2990_s2 + $0x30] sm:$0xff] }
 0x981   : > { %1400 = vrot.lane.b32.xlu2 %v1388_v44, %s1934_s19  ;;  %1420 = vrot.lane.b32.xlu0 %v1388_v44, %s1937_s20  ;;  %v1392_v63 = vmul.f32 %v1847_v14, %v1388_v44  ;;  %v1463_v14 = vld [vmem:[%s3000_s12 + $0x18] sm:$0xff] }
 0x982   : > { %1440 = vrot.lane.b32.xlu1 %v1388_v44, %s1936_s24 }
 0x986   : > { %v1379_v11 = vpop.f32.mrf.mxu3 }
 0x987   : > { %v1389_v45 = vadd.f32 %v1379_v11, %v1039_v37  ;;  %v1857_v11 = vld [vmem:[%s2990_s2 + $0x58] sm:$0xff] }
 0x989   : > { %1402 = vrot.lane.b32.xlu0 %v1389_v45, %s1934_s19  ;;  %v1393_v51 = vmul.f32 %v1850_v38, %v1389_v45 }
 0x98a   : > { %1422 = vrot.lane.b32.xlu1 %v1389_v45, %s1937_s20 }
 0x98e   : > { %v1382_v53 = vpop.f32.mrf.mxu3 }
 0x98f   : > { %v2843_v12 = vadd.f32 %v1382_v53, %v1042_v39 }
 0x991   : > { %1424 = vrot.lane.b32.xlu2 %v2843_v12, %s1937_s20 }
 0x992   : > { %1404 = vrot.lane.b32.xlu1 %v2843_v12, %s1934_s19 }
 0x996   : > { %v1385_v13 = vpop.f32.mrf.mxu3 }
 0x997   : > { %v1391_v23 = vadd.f32 %v1385_v13, %v1045_v9  ;;  %v1858_v13 = vld [vmem:[%s2990_s2 + $0x10] sm:$0xff] }
 0x999   : > { %1426 = vrot.lane.b32.xlu0 %v1391_v23, %s1937_s20  ;;  %1406 = vrot.lane.b32.xlu2 %v1391_v23, %s1934_s19  ;;  %v1395_v54 = vmul.f32 %v1855_v33, %v1391_v23 }
 0x99a   : > { %1446 = vrot.lane.b32.xlu1 %v1391_v23, %s1936_s24  ;;  %v1394_v23 = vmul.f32 %v1858_v13, %v2843_v12 }
 0x9a1   : > { %1444 = vrot.lane.b32.xlu0 %v2843_v12, %s1936_s24  ;;  %1442 = vrot.lane.b32.xlu2 %v1389_v45, %s1936_s24 }
 0x9db   : > { %v1401_v28 = vpop.permute.xlu2 %1400 }
 0x9dc   : > { %v1412_v62 = vmul.f32 %v1846_v61, %v1401_v28  ;;  %v1859_v61 = vld [vmem:[%s2990_s2 + $0x78] sm:$0xff] }
 0x9de   : > { %v1416_v25 = vadd.f32 %v1412_v62, %v1392_v63 }
 0x9eb   : > { %v1425_v48 = vpop.permute.xlu2 %1424 }
 0x9f3   : > { %v1421_v15 = vpop.permute.xlu0 %1420  ;;  %v1407_v24 = vpop.permute.xlu2 %1406 }
 0x9f4   : > { %v1432_v26 = vmul.f32 %v1848_v50, %v1421_v15  ;;  %v1441_v22 = vpop.permute.xlu1 %1440  ;;  %v1415_v32 = vmul.f32 %v1854_v31, %v1407_v24  ;;  %v1860_v24 = vld [vmem:[%s2990_s2 + $0x50] sm:$0xff] }
 0x9f5   : > { %v1452_v41 = vmul.f32 %v1849_v36, %v1441_v22 }
 0x9f6   : > { %v1436_v59 = vadd.f32 %v1432_v26, %v1416_v25  ;;  %v1419_v9 = vadd.f32 %v1415_v32, %v1395_v54  ;;  %v1434_v25 = vmul.f32 %v1860_v24, %v1425_v48  ;;  %v1476_v48 = vsub.f32 1.0, %v2779_v34 }
 0x9f8   : > { %v1456_v19 = vadd.f32 %v1452_v41, %v1436_v59  ;;  %v1462_v59 = vld [vmem:[%s3000_s12 + $0x10] sm:$0xff] }
 0x9fa   : > { %v1464_v8 = vadd.f32 %v1460_v42, %v1456_v19 }
 0x9fb   : > { %v1403_v20 = vpop.permute.xlu0 %1402  ;;  %v1443_v57 = vpop.permute.xlu2 %1442 }
 0x9fc   : > { %1833 = vtanh.f32 %v1464_v8  ;;  %v1413_v49 = vmul.f32 %v1851_v47, %v1403_v20  ;;  %v1423_v17 = vpop.permute.xlu1 %1422  ;;  %v1453_v60 = vmul.f32 %v1853_v55, %v1443_v57  ;;  %v1472_v20 = vmul.f32 %v1912_v3, %v2779_v34 }
 0x9fd   : > { %v1433_v40 = vmul.f32 %v1852_v58, %v1423_v17  ;;  %v1478_v3 = vsub.f32 1.0, %v2773_v27 }
 0x9fe   : > { %v1417_v18 = vadd.f32 %v1413_v49, %v1393_v51  ;;  %v1479_v51 = vsub.f32 1.0, %v2760_v56  ;;  %v1475_v49 = vmul.f32 %v1900_v0, %v2760_v56  ;;  %v1507_v56 = vld [vmem:[%s3001_s13 + $0x18] sm:$0xff] (%p52_p0) }
 0x9ff   :  { %1705 = vmatpush.msra.mxu2 (%p52_p0), %v1507_v56  ;;  %1545 = vmatpush.msra.mxu0 (%p52_p0), %v1507_v56 }
 0xa00   : > { %v1437_v16 = vadd.f32 %v1433_v40, %v1417_v18  ;;  %v1477_v18 = vsub.f32 1.0, %v2775_v30  ;;  %v1473_v40 = vmul.f32 %v1908_v2, %v2775_v30  ;;  %1706 = vmatpush.msra.mxu3 (%p52_p0), %v1507_v56  ;;  %1704 = vmatpush.msra.mxu1 (%p52_p0), %v1507_v56 }
 0xa02   : > { %v1834_v10 = vpop.eup %1833  ;;  %v1457_v21 = vadd.f32 %v1453_v60, %v1437_v16  ;;  %v1474_v16 = vmul.f32 %v1904_v1, %v2773_v27  ;;  %v1506_v27 = vld [vmem:[%s3001_s13 + $0x10] sm:$0xff] (%p52_p0) }
 0xa03   : > { %1484 = vrot.lane.b32.xlu2 %v1834_v10, %s1936_s24  ;;  %1708 = vmatpush.msra.mxu2 (%p52_p0), %v1506_v27 }
 0xa04   : > { %v1465_v35 = vadd.f32 %v1461_v46, %v1457_v21  ;;  %v1405_v52 = vpop.permute.xlu1 %1404  ;;  %1546 = vmatpush.msra.mxu0 (%p52_p0), %v1506_v27  ;;  %1709 = vmatpush.msra.mxu3 (%p52_p0), %v1506_v27 }
 0xa05   : > { %v1414_v44 = vmul.f32 %v1856_v43, %v1405_v52  ;;  %1707 = vmatpush.msra.mxu1 (%p52_p0), %v1506_v27  ;;  %1711 = vmatpush.msra.mxu2 (%p52_p0), %v1505_v7 }
 0xa06   : > { %1835 = vtanh.f32 %v1465_v35  ;;  %1547 = vmatpush.msra.mxu0 (%p52_p0), %v1505_v7  ;;  %1712 = vmatpush.msra.mxu3 (%p52_p0), %v1505_v7 }
 0xa07   : > { %v1418_v63 = vadd.f32 %v1414_v44, %v1394_v23  ;;  %1710 = vmatpush.msra.mxu1 (%p52_p0), %v1505_v7 }
 0xa09   : > { %v1438_v12 = vadd.f32 %v1434_v25, %v1418_v63 }
 0xa0b   : > { %v1427_v37 = vpop.permute.xlu0 %1426 }
 0xa0c   : > { %v1836_v39 = vpop.eup %1835  ;;  %v1435_v45 = vmul.f32 %v1857_v11, %v1427_v37  ;;  %v1447_v53 = vpop.permute.xlu1 %1446 }
 0xa0d   : > { %1486 = vrot.lane.b32.xlu0 %v1836_v39, %s1936_s24  ;;  %v1455_v62 = vmul.f32 %v1859_v61, %v1447_v53 }
 0xa0e   : > { %v1439_v28 = vadd.f32 %v1435_v45, %v1419_v9 }
 0xa10   : > { %v1459_v15 = vadd.f32 %v1455_v62, %v1439_v28 }
 0xa12   : > { %v1467_v50 = vadd.f32 %v1463_v14, %v1459_v15 }
 0xa13   : > { %v1445_v26 = vpop.permute.xlu0 %1444 }
 0xa14   : > { %1837 = vtanh.f32 %v1467_v50  ;;  %v1454_v22 = vmul.f32 %v2754_v29, %v1445_v26 }
 0xa16   : > { %v1458_v36 = vadd.f32 %v1454_v22, %v1438_v12 }
 0xa18   : > { %v1466_v41 = vadd.f32 %v1462_v59, %v1458_v36 }
 0xa1a   : > { %v1838_v42 = vpop.eup %1837  ;;  %1839 = vtanh.f32 %v1466_v41 }
 0xa1b   : > { %1490 = vrot.lane.b32.xlu2 %v1838_v42, %s1936_s24 }
 0xa20   : > { %v1840_v19 = vpop.eup %1839 }
 0xa21   : > { %1488 = vrot.lane.b32.xlu1 %v1840_v19, %s1936_s24 }
 0xa5d   : > { %v1485_v8 = vpop.permute.xlu2 %1484 }
 0xa5e   : > { %v1496_v29 = vmul.f32 %v1485_v8, %v1476_v48 }
 0xa60   : > { %v1500_v38 = vadd.f32 %v1496_v29, %v1472_v20  }
 0xa62   :  { %1516 = vrot.lane.b32.xlu1 (%p52_p0), %v1500_v38, %s1938_s23 }
 0xa75   : > { %v1491_v47 = vpop.permute.xlu2 %1490 }
 0xa76   : > { %v1499_v17 = vmul.f32 %v1491_v47, %v1479_v51 }
 0xa78   : > { %v1503_v57 = vadd.f32 %v1499_v17, %v1475_v49  }
 0xa7a   : > { %v3010_v0 = vmov %v1503_v57 }
 0xa7b   :  { %v1504_v0 = vld [vmem:[%s3001_s13] sm:$0xff] (%p52_p0) }
 0xa7c   :  { %1714 = vmatpush.msra.mxu2 (%p52_p0), %v1504_v0  ;;  %1548 = vmatpush.msra.mxu0 (%p52_p0), %v1504_v0 }
 0xa7d   :  { %1715 = vmatpush.msra.mxu3 (%p52_p0), %v1504_v0  ;;  %1713 = vmatpush.msra.mxu1 (%p52_p0), %v1504_v0 }
 0xa7f   : > { %v1487_v58 = vpop.permute.xlu0 %1486 }
 0xa80   : > { %v1497_v55 = vmul.f32 %v1487_v58, %v1477_v18 }
 0xa82   : > { %v1501_v60 = vadd.f32 %v1497_v55, %v1473_v40  }
 0xa84   : > { %v3012_v2 = vmov %v1501_v60  ;;  %1518 = vrot.lane.b32.xlu1 (%p52_p0), %v1501_v60, %s1938_s23 }
 0xa93   : > { %v1489_v34 = vpop.permute.xlu1 %1488 }
 0xa94   : > { %v1498_v46 = vmul.f32 %v1489_v34, %v1478_v3  ;;  %v3013_v3 = vmov %v1500_v38  ;;  %54 = sbr.rel (!%p52_p0) target bundleno = 2 (0x2), region = 92 }
 0xa96   : > { %v1502_v10 = vadd.f32 %v1498_v46, %v1474_v16  }
 0xa98   : > { %v3011_v1 = vmov %v1502_v10  ;;  %1520 = vrot.lane.b32.xlu0 (%p52_p0), %v1502_v10, %s1938_s23 }
 0xaa0   :  { %1522 = vrot.lane.b32.xlu0 %v1503_v57, %s1938_s23 }
 0xad4   :  { %v1517_v2 = vpop.permute.xlu1 %1516 }
 0xad5   :  { %1698 = vmatmul.msk.f32.vlgmr.msra.gmra.mxu0 %vm74_vm0, %v1517_v2 }
 0xaf6   :  { %v1519_v5 = vpop.permute.xlu1 %1518 }
 0xaf7   :  { %1699 = vmatmul.msk.f32.vlgmr.msra.gmra.mxu1 %vm74_vm0, %v1519_v5 }
 0xb0a   :  { %v1521_v1 = vpop.permute.xlu0 %1520 }
 0xb0b   :  { %1700 = vmatmul.msk.f32.vlgmr.msra.gmra.mxu2 %vm74_vm0, %v1521_v1 }
 0xb12   :  { %v1523_v4 = vpop.permute.xlu0 %1522 }
 0xb13   :  { %1701 = vmatmul.msk.f32.vlgmr.msra.gmra.mxu3 %vm74_vm0, %v1523_v4 }
 0xb52   :  { %v1550_v30 = vpop.f32.mrf.mxu0 }
 0xb53   :  { %v1551_v21 = vadd.f32 %v1861_v6, %v1550_v30 }
 0xb55   :  { %1563 = vst.msk [vmem:[%s3003_s15] sm:$0xff] %vm212_vm3, %v1551_v21 }
 0xb74   :  { %v1553_v31 = vpop.f32.mrf.mxu1 }
 0xb75   :  { %v1554_v32 = vadd.f32 %v1861_v6, %v1553_v31 }
 0xb77   :  { %1564 = vst.msk [vmem:[%s3003_s15 + $0x8] sm:$0xff] %vm212_vm3, %v1554_v32 }
 0xb8e   :  { %v1556_v35 = vpop.f32.mrf.mxu2 }
 0xb8f   :  { %v1557_v52 = vadd.f32 %v1861_v6, %v1556_v35 }
 0xb91   :  { %1565 = vst.msk [vmem:[%s3003_s15 + $0x10] sm:$0xff] %vm212_vm3, %v1557_v52 }
 0xb96   :  { %v1559_v33 = vpop.f32.mrf.mxu3 }
 0xb97   :  { %v1560_v54 = vadd.f32 %v1861_v6, %v1559_v33 }
 0xb99   :  { %1566 = vst.msk [vmem:[%s3003_s15 + $0x18] sm:$0xff] %vm212_vm3, %v1560_v54 }

</bundles_post_ra>
